<compile_context>
chip_gen: v7x
topology: tpu7x:2x2x1
jax: 0.10.0
libtpu: 0.0.40
codegen_flags: <defaults>
</compile_context>

<pallas_src>
import numpy as np

import jax
import jax.numpy as jnp
from jax.experimental import pallas as pl
from jax.experimental.pallas import tpu as pltpu

H = W = 16                      # game_config.environment_size() == H*W
ENV_SIZE = H * W
EPS = 1e-5                      # PyTorch BatchNorm2d default eps

# tap order t = (dy+1)*3 + (dx+1) == ky*3 + kx (row-major 3x3 kernel)
_TAPS = tuple((dy, dx) for dy in (-1, 0, 1) for dx in (-1, 0, 1))

# ---- packed parameter slab: ONE (P_ROWS, 256) f32 VMEM-resident array ----
ROW_W_SCONV = 0      # rows 0-1 : (2, 36) packed s_convolution weight
ROW_W_RES0  = 2      # rows 2-3 : (2, 18) residual block 0
ROW_W_RES1  = 4      # rows 4-5 : (2, 18) residual block 1
ROW_W_RCONV = 6      # row  6   : (1, 18) r_convolution
ROW_MASK    = 8      # rows 8-16: (9, 256) zero-padding masks for the 9 taps
ROW_LINW    = 17     # row 17   : (1, 256) r_linear weight (row-major flatten order)
ROW_GAMMA   = 18     # rows 18-24: BN gamma, channel order sconv(2) res0(2) res1(2) rconv(1)
ROW_BETA    = 25     # rows 25-31: BN beta, same order
ROW_LINB    = 32     # row 32   : r_linear bias (broadcast over lanes)
ROW_SLINW   = 33     # row 33   : sum(lin_w) (broadcast), for the folded reward head
P_ROWS      = 40     # padded to a multiple of 8 sublanes

PARAM_SHAPES = {
    "sconv_w": (2, 4, 3, 3), "sconv_b": (2,), "sconv_g": (2,), "sconv_beta": (2,),
    "res0_w": (2, 2, 3, 3),  "res0_b": (2,),  "res0_g": (2,),  "res0_beta": (2,),
    "res1_w": (2, 2, 3, 3),  "res1_b": (2,),  "res1_g": (2,),  "res1_beta": (2,),
    "rconv_w": (1, 2, 3, 3), "rconv_b": (1,), "rconv_g": (1,), "rconv_beta": (1,),
    "lin_w": (1, ENV_SIZE),  "lin_b": (1,),
}


def _build_tap_masks():
    """Host-side (9, H*W) f32 validity masks: zero-padding for each (dy,dx) tap."""
    yy, xx = np.meshgrid(np.arange(H), np.arange(W), indexing="ij")
    masks = []
    for dy, dx in _TAPS:
        valid = (yy + dy >= 0) & (yy + dy < H) & (xx + dx >= 0) & (xx + dx < W)
        masks.append(valid.reshape(ENV_SIZE))
    return np.stack(masks).astype(np.float32)


_TAP_MASKS = _build_tap_masks()


# --------------------------- kernel (one sample per grid step) ---------------------------
def _kernel(state_ref, action_ref, p_ref, out_ref):
    inv_n = 1.0 / float(ENV_SIZE)

    def tap_stack(act):
        """(cin, 256) -> (9*cin, 256): the 9 zero-padded 3x3 taps as a value (no scratch)."""
        parts = []
        for t, (dy, dx) in enumerate(_TAPS):
            if dy == 0 and dx == 0:
                parts.append(act)                          # center tap: no shift / mask
            else:
                sh = (-(dy * W + dx)) % ENV_SIZE           # jnp.roll convention
                parts.append(pltpu.roll(act, sh, axis=1)
                             * p_ref[ROW_MASK + t:ROW_MASK + t + 1, :])
        return jnp.concatenate(parts, axis=0)

    def conv3x3(act, w):
        # Single-pass bf16 MXU matmul (default precision), f32 accumulation.
        # Conv bias omitted: training-mode BN mean subtraction cancels it exactly.
        return jnp.dot(w, tap_stack(act), preferred_element_type=jnp.float32)

    def batchnorm(y, ch0, cout):
        # One fused lane reduction for sum(y) and sum(y*y).
        red = jnp.sum(jnp.concatenate([y, y * y], axis=0),
                      axis=1, keepdims=True) * inv_n       # (2*cout, 1)
        mu = red[0:cout, :]
        var = jnp.maximum(red[cout:2 * cout, :] - mu * mu, 0.0)
        g = p_ref[ROW_GAMMA + ch0:ROW_GAMMA + ch0 + cout, :]   # (cout, 256), lane-broadcast
        b = p_ref[ROW_BETA + ch0:ROW_BETA + ch0 + cout, :]
        return (y - mu) * jax.lax.rsqrt(var + EPS) * g + b

    # cat(state, action) along channels, carried lane-dense as (4, 256).
    x = jnp.concatenate([state_ref[...], action_ref[...]], axis=0)

    s = batchnorm(conv3x3(x, p_ref[ROW_W_SCONV:ROW_W_SCONV + 2, 0:36]), 0, 2)      # s_convolution
    s = jnp.maximum(batchnorm(conv3x3(s, p_ref[ROW_W_RES0:ROW_W_RES0 + 2, 0:18]), 2, 2) + s, 0.0)
    s = jnp.maximum(batchnorm(conv3x3(s, p_ref[ROW_W_RES1:ROW_W_RES1 + 2, 0:18]), 4, 2) + s, 0.0)

    # Reward head, algebraically folded:
    #   r = tanh(sum(linw * BN(conv(s))) + linb)
    #     = tanh(k*sum(linw*y) - k*mu*sum(linw) + beta*sum(linw) + linb),  k = g*rsqrt(var+eps)
    y = conv3x3(s, p_ref[ROW_W_RCONV:ROW_W_RCONV + 1, 0:18])                       # (1, 256) raw
    linw = p_ref[ROW_LINW:ROW_LINW + 1, :]
    red = jnp.sum(jnp.concatenate([y, y * y, linw * y], axis=0),
                  axis=1, keepdims=True)                                           # (3, 1)
    mu = red[0:1, :] * inv_n
    var = jnp.maximum(red[1:2, :] * inv_n - mu * mu, 0.0)
    sly = red[2:3, :]
    g = p_ref[ROW_GAMMA + 6:ROW_GAMMA + 7, 0:1]
    beta = p_ref[ROW_BETA + 6:ROW_BETA + 7, 0:1]
    slinw = p_ref[ROW_SLINW:ROW_SLINW + 1, 0:1]
    linb = p_ref[ROW_LINB:ROW_LINB + 1, 0:1]
    k = g * jax.lax.rsqrt(var + EPS)
    r = jnp.tanh(k * sly - k * mu * slinw + beta * slinw + linb)                   # (1, 1)

    # Single lane-dense store: rows 0-1 = s, row 2 = r broadcast.
    out_ref[...] = jnp.concatenate([s, jnp.broadcast_to(r, (1, ENV_SIZE))], axis=0)


# --------------------------- host-side one-time parameter packing ---------------------------
def pack_params(params):
    """Pack all module parameters into a single (P_ROWS, 256) f32 slab. Run once, off the hot path."""
    def pack_w(w):
        # (cout, cin, 3, 3) -> (cout, 9*cin), column index t*cin + c with t = ky*3 + kx.
        w = np.asarray(w, np.float32)
        cout, cin = w.shape[0], w.shape[1]
        return np.transpose(w, (0, 2, 3, 1)).reshape(cout, 9 * cin)

    slab = np.zeros((P_ROWS, ENV_SIZE), np.float32)
    slab[ROW_W_SCONV:ROW_W_SCONV + 2, 0:36] = pack_w(params["sconv_w"])
    slab[ROW_W_RES0:ROW_W_RES0 + 2, 0:18] = pack_w(params["res0_w"])
    slab[ROW_W_RES1:ROW_W_RES1 + 2, 0:18] = pack_w(params["res1_w"])
    slab[ROW_W_RCONV:ROW_W_RCONV + 1, 0:18] = pack_w(params["rconv_w"])
    slab[ROW_MASK:ROW_MASK + 9, :] = _TAP_MASKS
    linw = np.asarray(params["lin_w"], np.float32).reshape(ENV_SIZE)
    slab[ROW_LINW, :] = linw
    gamma = np.concatenate([np.asarray(params[k], np.float32).reshape(-1)
                            for k in ("sconv_g", "res0_g", "res1_g", "rconv_g")])
    beta = np.concatenate([np.asarray(params[k], np.float32).reshape(-1)
                           for k in ("sconv_beta", "res0_beta", "res1_beta", "rconv_beta")])
    slab[ROW_GAMMA:ROW_GAMMA + 7, :] = gamma[:, None]
    slab[ROW_BETA:ROW_BETA + 7, :] = beta[:, None]
    slab[ROW_LINB, :] = float(np.asarray(params["lin_b"]).reshape(()))
    slab[ROW_SLINW, :] = float(linw.sum())
    # Conv biases intentionally NOT packed: BN (training-mode batch stats) cancels them.
    return jnp.asarray(slab)


# --------------------------- entry points ---------------------------
@jax.jit
def dynamics_forward_batched(state, action, packed):
    """state, action: (B, 2, H, W) f32. Returns (r: (B,), s: (B, 2, H, W)).
    One pallas_call; grid over B marked "parallel" (megacore / second TC on v7x)."""
    B = state.shape[0]
    st = state.reshape(B, 2, ENV_SIZE).astype(jnp.float32)
    ac = action.reshape(B, 2, ENV_SIZE).astype(jnp.float32)
    out = pl.pallas_call(
        _kernel,
        out_shape=jax.ShapeDtypeStruct((B, 3, ENV_SIZE), jnp.float32),
        grid=(B,),
        in_specs=[
            pl.BlockSpec((None, 2, ENV_SIZE), lambda b: (b, 0, 0)),
            pl.BlockSpec((None, 2, ENV_SIZE), lambda b: (b, 0, 0)),
            pl.BlockSpec((P_ROWS, ENV_SIZE), lambda b: (0, 0)),   # grid-invariant: fetched once
        ],
        out_specs=pl.BlockSpec((None, 3, ENV_SIZE), lambda b: (b, 0, 0)),
        compiler_params=pltpu.CompilerParams(dimension_semantics=("parallel",)),
    )(st, ac, packed)
    r = out[:, 2, 0]
    s = out[:, 0:2, :].reshape(B, 2, H, W)
    return r, s


def dynamics_forward(state, action, packed):
    """Single-sample forward matching the nn.Module (state/action: (1, 2, H, W))."""
    r, s = dynamics_forward_batched(state, action, packed)
    return r, s                     # r: (1,), s: (1, 2, H, W)


def init_params(key):
    names = list(PARAM_SHAPES)
    keys = jax.random.split(key, len(names))
    params = {}
    for k, name in zip(keys, names):
        shape = PARAM_SHAPES[name]
        if name.endswith("_g"):            # BN gamma near 1
            params[name] = (1.0 + 0.1 * jax.random.normal(k, shape)).astype(jnp.float32)
        elif name == "lin_w":
            params[name] = (0.05 * jax.random.normal(k, shape)).astype(jnp.float32)
        elif name.endswith("_w"):
            params[name] = (0.3 * jax.random.normal(k, shape)).astype(jnp.float32)
        else:                              # conv biases, BN beta, linear bias
            params[name] = (0.1 * jax.random.normal(k, shape)).astype(jnp.float32)
    return params


# --------------------------- pure-JAX reference (semantics check) ---------------------------
def _conv_bn_ref(x, w, b, g, beta):
    y = jax.lax.conv_general_dilated(x, w, (1, 1), ((1, 1), (1, 1)),
                                     dimension_numbers=("NCHW", "OIHW", "NCHW"),
                                     precision=jax.lax.Precision.HIGHEST)
    y = y + b[None, :, None, None]
    mu = jnp.mean(y, axis=(0, 2, 3), keepdims=True)
    var = jnp.mean((y - mu) ** 2, axis=(0, 2, 3), keepdims=True)
    return (y - mu) * jax.lax.rsqrt(var + EPS) * g[None, :, None, None] + beta[None, :, None, None]


def dynamics_ref(state, action, params):
    s = jnp.concatenate([state, action], axis=1)
    s = _conv_bn_ref(s, params["sconv_w"], params["sconv_b"],
                     params["sconv_g"], params["sconv_beta"])
    for blk in range(2):
        y = _conv_bn_ref(s, params[f"res{blk}_w"], params[f"res{blk}_b"],
                         params[f"res{blk}_g"], params[f"res{blk}_beta"])
        s = jnp.maximum(y + s, 0.0)
    r = _conv_bn_ref(s, params["rconv_w"], params["rconv_b"],
                     params["rconv_g"], params["rconv_beta"])
    r = jnp.tanh(params["lin_w"] @ r.reshape(-1) + params["lin_b"])
    return r, s


if __name__ == "__main__":
    key = jax.random.PRNGKey(0)
    k_state, k_action, k_params = jax.random.split(key, 3)
    params = init_params(k_params)
    packed = pack_params(params)           # one-time host-side packing

    # Single-sample call (module semantics: forward(state, action), N == 1).
    state = jax.random.normal(k_state, (1, 2, H, W), dtype=jnp.float32)
    action = jax.random.normal(k_action, (1, 2, H, W), dtype=jnp.float32)
    r1, s1 = dynamics_forward(state, action, packed)
    jax.block_until_ready((r1, s1))

    # Batched call: one pallas_call, "parallel" grid over B independent samples.
    B = 4
    kb1, kb2 = jax.random.split(jax.random.PRNGKey(1))
    states = jax.random.normal(kb1, (B, 2, H, W), dtype=jnp.float32)
    actions = jax.random.normal(kb2, (B, 2, H, W), dtype=jnp.float32)
    rb, sb = dynamics_forward_batched(states, actions, packed)
    jax.block_until_ready((rb, sb))

    # Validate vs the f32 reference. Kernel uses single-pass bf16 MXU matmuls
    # (per perf review), so tolerance is 2e-2 instead of the f32-HIGHEST 1e-2.
    r_ref, s_ref = dynamics_ref(state, action, params)
    assert r1.shape == (1,) and s1.shape == (1, 2, H, W)
    assert jnp.allclose(r1, r_ref, atol=2e-2, rtol=2e-2), (r1, r_ref)
    assert jnp.allclose(s1, s_ref, atol=2e-2, rtol=2e-2)
    for i in range(B):
        rr, ss = dynamics_ref(states[i:i + 1], actions[i:i + 1], params)
        assert jnp.allclose(rb[i], rr[0], atol=2e-2, rtol=2e-2)
        assert jnp.allclose(sb[i], ss[0], atol=2e-2, rtol=2e-2)
    print("KERNEL_OK")
</pallas_src>

<mosaic_0001>
module attributes {stable_mosaic.version = 11 : i64} {
  func.func @_kernel(%arg0: i32, %arg1: memref<1x2x256xf32, #tpu.memory_space<vmem>>, %arg2: memref<1x2x256xf32, #tpu.memory_space<vmem>>, %arg3: memref<40x256xf32, #tpu.memory_space<vmem>>, %arg4: memref<1x3x256xf32, #tpu.memory_space<vmem>>) attributes {dimension_semantics = [#tpu.dimension_semantics<parallel>], iteration_bounds = array<i64: 1>, scalar_prefetch = 0 : i64, scratch_operands = 0 : i64, tpu.core_type = #tpu.core_type<tc>, window_params = [{transform_indices = @transform_0, window_bounds = array<i64: 1, 2, 256>}, {transform_indices = @transform_1, window_bounds = array<i64: 1, 2, 256>}, {pipeline_mode = #tpu.pipeline_mode<synchronous>, transform_indices = @transform_2, window_bounds = array<i64: 40, 256>}, {transform_indices = @transform_3, window_bounds = array<i64: 1, 3, 256>}]} {
    %c0 = arith.constant 0 : index
    %c0_0 = arith.constant 0 : index
    %c0_1 = arith.constant 0 : index
    %0 = vector.load %arg1[%c0, %c0_0, %c0_1] : memref<1x2x256xf32, #tpu.memory_space<vmem>>, vector<1x2x256xf32>
    %1 = vector.shape_cast %0 : vector<1x2x256xf32> to vector<2x256xf32>
    %c0_2 = arith.constant 0 : index
    %c0_3 = arith.constant 0 : index
    %c0_4 = arith.constant 0 : index
    %2 = vector.load %arg2[%c0_2, %c0_3, %c0_4] : memref<1x2x256xf32, #tpu.memory_space<vmem>>, vector<1x2x256xf32>
    %3 = vector.shape_cast %2 : vector<1x2x256xf32> to vector<2x256xf32>
    %4 = tpu.concatenate %1, %3 in 0 : vector<2x256xf32>, vector<2x256xf32> -> vector<4x256xf32>
    %c0_5 = arith.constant 0 : index
    %c0_6 = arith.constant 0 : index
    %5 = vector.load %arg3[%c0_5, %c0_6] : memref<40x256xf32, #tpu.memory_space<vmem>>, vector<2x36xf32>
    %c17_i32 = arith.constant 17 : i32
    %6 = tpu.dynamic_rotate %4 by %c17_i32 dim 1 : vector<4x256xf32>, i32 -> vector<4x256xf32>
    %c8 = arith.constant 8 : index
    %c0_7 = arith.constant 0 : index
    %7 = vector.load %arg3[%c8, %c0_7] : memref<40x256xf32, #tpu.memory_space<vmem>>, vector<1x256xf32>
    %8 = vector.broadcast %7 : vector<1x256xf32> to vector<4x256xf32>
    %9 = arith.mulf %6, %8 : vector<4x256xf32>
    %c16_i32 = arith.constant 16 : i32
    %10 = tpu.dynamic_rotate %4 by %c16_i32 dim 1 : vector<4x256xf32>, i32 -> vector<4x256xf32>
    %c9 = arith.constant 9 : index
    %c0_8 = arith.constant 0 : index
    %11 = vector.load %arg3[%c9, %c0_8] : memref<40x256xf32, #tpu.memory_space<vmem>>, vector<1x256xf32>
    %12 = vector.broadcast %11 : vector<1x256xf32> to vector<4x256xf32>
    %13 = arith.mulf %10, %12 : vector<4x256xf32>
    %c15_i32 = arith.constant 15 : i32
    %14 = tpu.dynamic_rotate %4 by %c15_i32 dim 1 : vector<4x256xf32>, i32 -> vector<4x256xf32>
    %c10 = arith.constant 10 : index
    %c0_9 = arith.constant 0 : index
    %15 = vector.load %arg3[%c10, %c0_9] : memref<40x256xf32, #tpu.memory_space<vmem>>, vector<1x256xf32>
    %16 = vector.broadcast %15 : vector<1x256xf32> to vector<4x256xf32>
    %17 = arith.mulf %14, %16 : vector<4x256xf32>
    %c1_i32 = arith.constant 1 : i32
    %18 = tpu.dynamic_rotate %4 by %c1_i32 dim 1 : vector<4x256xf32>, i32 -> vector<4x256xf32>
    %c11 = arith.constant 11 : index
    %c0_10 = arith.constant 0 : index
    %19 = vector.load %arg3[%c11, %c0_10] : memref<40x256xf32, #tpu.memory_space<vmem>>, vector<1x256xf32>
    %20 = vector.broadcast %19 : vector<1x256xf32> to vector<4x256xf32>
    %21 = arith.mulf %18, %20 : vector<4x256xf32>
    %c255_i32 = arith.constant 255 : i32
    %22 = tpu.dynamic_rotate %4 by %c255_i32 dim 1 : vector<4x256xf32>, i32 -> vector<4x256xf32>
    %c13 = arith.constant 13 : index
    %c0_11 = arith.constant 0 : index
    %23 = vector.load %arg3[%c13, %c0_11] : memref<40x256xf32, #tpu.memory_space<vmem>>, vector<1x256xf32>
    %24 = vector.broadcast %23 : vector<1x256xf32> to vector<4x256xf32>
    %25 = arith.mulf %22, %24 : vector<4x256xf32>
    %c241_i32 = arith.constant 241 : i32
    %26 = tpu.dynamic_rotate %4 by %c241_i32 dim 1 : vector<4x256xf32>, i32 -> vector<4x256xf32>
    %c14 = arith.constant 14 : index
    %c0_12 = arith.constant 0 : index
    %27 = vector.load %arg3[%c14, %c0_12] : memref<40x256xf32, #tpu.memory_space<vmem>>, vector<1x256xf32>
    %28 = vector.broadcast %27 : vector<1x256xf32> to vector<4x256xf32>
    %29 = arith.mulf %26, %28 : vector<4x256xf32>
    %c240_i32 = arith.constant 240 : i32
    %30 = tpu.dynamic_rotate %4 by %c240_i32 dim 1 : vector<4x256xf32>, i32 -> vector<4x256xf32>
    %c15 = arith.constant 15 : index
    %c0_13 = arith.constant 0 : index
    %31 = vector.load %arg3[%c15, %c0_13] : memref<40x256xf32, #tpu.memory_space<vmem>>, vector<1x256xf32>
    %32 = vector.broadcast %31 : vector<1x256xf32> to vector<4x256xf32>
    %33 = arith.mulf %30, %32 : vector<4x256xf32>
    %c239_i32 = arith.constant 239 : i32
    %34 = tpu.dynamic_rotate %4 by %c239_i32 dim 1 : vector<4x256xf32>, i32 -> vector<4x256xf32>
    %c16 = arith.constant 16 : index
    %c0_14 = arith.constant 0 : index
    %35 = vector.load %arg3[%c16, %c0_14] : memref<40x256xf32, #tpu.memory_space<vmem>>, vector<1x256xf32>
    %36 = vector.broadcast %35 : vector<1x256xf32> to vector<4x256xf32>
    %37 = arith.mulf %34, %36 : vector<4x256xf32>
    %38 = tpu.concatenate %9, %13, %17, %21, %4, %25, %29, %33, %37 in 0 : vector<4x256xf32>, vector<4x256xf32>, vector<4x256xf32>, vector<4x256xf32>, vector<4x256xf32>, vector<4x256xf32>, vector<4x256xf32>, vector<4x256xf32>, vector<4x256xf32> -> vector<36x256xf32>
    %cst = arith.constant dense<0.000000e+00> : vector<2x256xf32>
    %39 = tpu.matmul %5, %38, %cst {dimension_numbers = #tpu.dot_dimension_numbers<[1], [0], [0], [1], [0, 0, 1, 1], [], []>} : vector<2x36xf32>, vector<36x256xf32>, vector<2x256xf32> -> vector<2x256xf32>
    %40 = arith.mulf %39, %39 : vector<2x256xf32>
    %41 = tpu.concatenate %39, %40 in 0 : vector<2x256xf32>, vector<2x256xf32> -> vector<4x256xf32>
    %cst_15 = arith.constant dense<0.000000e+00> : vector<4xf32>
    %42 = vector.multi_reduction <add>, %41, %cst_15 [1] : vector<4x256xf32> to vector<4xf32>
    %43 = vector.shape_cast %42 : vector<4xf32> to vector<4x1xf32>
    %cst_16 = arith.constant 3.906250e-03 : f32
    %44 = vector.broadcast %cst_16 : f32 to vector<4x1xf32>
    %45 = arith.mulf %43, %44 : vector<4x1xf32>
    %46 = vector.extract_strided_slice %45 {offsets = [0, 0], sizes = [2, 1], strides = [1, 1]} : vector<4x1xf32> to vector<2x1xf32>
    %47 = vector.extract_strided_slice %45 {offsets = [2, 0], sizes = [2, 1], strides = [1, 1]} : vector<4x1xf32> to vector<2x1xf32>
    %48 = arith.mulf %46, %46 : vector<2x1xf32>
    %49 = arith.subf %47, %48 : vector<2x1xf32>
    %cst_17 = arith.constant 0.000000e+00 : f32
    %50 = vector.broadcast %cst_17 : f32 to vector<2x1xf32>
    %51 = arith.maximumf %49, %50 : vector<2x1xf32>
    %c18 = arith.constant 18 : index
    %c0_18 = arith.constant 0 : index
    %52 = vector.load %arg3[%c18, %c0_18] : memref<40x256xf32, #tpu.memory_space<vmem>>, vector<2x256xf32>
    %c25 = arith.constant 25 : index
    %c0_19 = arith.constant 0 : index
    %53 = vector.load %arg3[%c25, %c0_19] : memref<40x256xf32, #tpu.memory_space<vmem>>, vector<2x256xf32>
    %54 = vector.broadcast %46 : vector<2x1xf32> to vector<2x256xf32>
    %55 = arith.subf %39, %54 : vector<2x256xf32>
    %cst_20 = arith.constant 9.99999974E-6 : f32
    %56 = vector.broadcast %cst_20 : f32 to vector<2x1xf32>
    %57 = arith.addf %51, %56 : vector<2x1xf32>
    %58 = math.rsqrt %57 : vector<2x1xf32>
    %59 = vector.broadcast %58 : vector<2x1xf32> to vector<2x256xf32>
    %60 = arith.mulf %55, %59 : vector<2x256xf32>
    %61 = arith.mulf %60, %52 : vector<2x256xf32>
    %62 = arith.addf %61, %53 : vector<2x256xf32>
    %c2 = arith.constant 2 : index
    %c0_21 = arith.constant 0 : index
    %63 = vector.load %arg3[%c2, %c0_21] : memref<40x256xf32, #tpu.memory_space<vmem>>, vector<2x18xf32>
    %c17_i32_22 = arith.constant 17 : i32
    %64 = tpu.dynamic_rotate %62 by %c17_i32_22 dim 1 : vector<2x256xf32>, i32 -> vector<2x256xf32>
    %c8_23 = arith.constant 8 : index
    %c0_24 = arith.constant 0 : index
    %65 = vector.load %arg3[%c8_23, %c0_24] : memref<40x256xf32, #tpu.memory_space<vmem>>, vector<1x256xf32>
    %66 = vector.broadcast %65 : vector<1x256xf32> to vector<2x256xf32>
    %67 = arith.mulf %64, %66 : vector<2x256xf32>
    %c16_i32_25 = arith.constant 16 : i32
    %68 = tpu.dynamic_rotate %62 by %c16_i32_25 dim 1 : vector<2x256xf32>, i32 -> vector<2x256xf32>
    %c9_26 = arith.constant 9 : index
    %c0_27 = arith.constant 0 : index
    %69 = vector.load %arg3[%c9_26, %c0_27] : memref<40x256xf32, #tpu.memory_space<vmem>>, vector<1x256xf32>
    %70 = vector.broadcast %69 : vector<1x256xf32> to vector<2x256xf32>
    %71 = arith.mulf %68, %70 : vector<2x256xf32>
    %c15_i32_28 = arith.constant 15 : i32
    %72 = tpu.dynamic_rotate %62 by %c15_i32_28 dim 1 : vector<2x256xf32>, i32 -> vector<2x256xf32>
    %c10_29 = arith.constant 10 : index
    %c0_30 = arith.constant 0 : index
    %73 = vector.load %arg3[%c10_29, %c0_30] : memref<40x256xf32, #tpu.memory_space<vmem>>, vector<1x256xf32>
    %74 = vector.broadcast %73 : vector<1x256xf32> to vector<2x256xf32>
    %75 = arith.mulf %72, %74 : vector<2x256xf32>
    %c1_i32_31 = arith.constant 1 : i32
    %76 = tpu.dynamic_rotate %62 by %c1_i32_31 dim 1 : vector<2x256xf32>, i32 -> vector<2x256xf32>
    %c11_32 = arith.constant 11 : index
    %c0_33 = arith.constant 0 : index
    %77 = vector.load %arg3[%c11_32, %c0_33] : memref<40x256xf32, #tpu.memory_space<vmem>>, vector<1x256xf32>
    %78 = vector.broadcast %77 : vector<1x256xf32> to vector<2x256xf32>
    %79 = arith.mulf %76, %78 : vector<2x256xf32>
    %c255_i32_34 = arith.constant 255 : i32
    %80 = tpu.dynamic_rotate %62 by %c255_i32_34 dim 1 : vector<2x256xf32>, i32 -> vector<2x256xf32>
    %c13_35 = arith.constant 13 : index
    %c0_36 = arith.constant 0 : index
    %81 = vector.load %arg3[%c13_35, %c0_36] : memref<40x256xf32, #tpu.memory_space<vmem>>, vector<1x256xf32>
    %82 = vector.broadcast %81 : vector<1x256xf32> to vector<2x256xf32>
    %83 = arith.mulf %80, %82 : vector<2x256xf32>
    %c241_i32_37 = arith.constant 241 : i32
    %84 = tpu.dynamic_rotate %62 by %c241_i32_37 dim 1 : vector<2x256xf32>, i32 -> vector<2x256xf32>
    %c14_38 = arith.constant 14 : index
    %c0_39 = arith.constant 0 : index
    %85 = vector.load %arg3[%c14_38, %c0_39] : memref<40x256xf32, #tpu.memory_space<vmem>>, vector<1x256xf32>
    %86 = vector.broadcast %85 : vector<1x256xf32> to vector<2x256xf32>
    %87 = arith.mulf %84, %86 : vector<2x256xf32>
    %c240_i32_40 = arith.constant 240 : i32
    %88 = tpu.dynamic_rotate %62 by %c240_i32_40 dim 1 : vector<2x256xf32>, i32 -> vector<2x256xf32>
    %c15_41 = arith.constant 15 : index
    %c0_42 = arith.constant 0 : index
    %89 = vector.load %arg3[%c15_41, %c0_42] : memref<40x256xf32, #tpu.memory_space<vmem>>, vector<1x256xf32>
    %90 = vector.broadcast %89 : vector<1x256xf32> to vector<2x256xf32>
    %91 = arith.mulf %88, %90 : vector<2x256xf32>
    %c239_i32_43 = arith.constant 239 : i32
    %92 = tpu.dynamic_rotate %62 by %c239_i32_43 dim 1 : vector<2x256xf32>, i32 -> vector<2x256xf32>
    %c16_44 = arith.constant 16 : index
    %c0_45 = arith.constant 0 : index
    %93 = vector.load %arg3[%c16_44, %c0_45] : memref<40x256xf32, #tpu.memory_space<vmem>>, vector<1x256xf32>
    %94 = vector.broadcast %93 : vector<1x256xf32> to vector<2x256xf32>
    %95 = arith.mulf %92, %94 : vector<2x256xf32>
    %96 = tpu.concatenate %67, %71, %75, %79, %62, %83, %87, %91, %95 in 0 : vector<2x256xf32>, vector<2x256xf32>, vector<2x256xf32>, vector<2x256xf32>, vector<2x256xf32>, vector<2x256xf32>, vector<2x256xf32>, vector<2x256xf32>, vector<2x256xf32> -> vector<18x256xf32>
    %cst_46 = arith.constant dense<0.000000e+00> : vector<2x256xf32>
    %97 = tpu.matmul %63, %96, %cst_46 {dimension_numbers = #tpu.dot_dimension_numbers<[1], [0], [0], [1], [0, 0, 1, 1], [], []>} : vector<2x18xf32>, vector<18x256xf32>, vector<2x256xf32> -> vector<2x256xf32>
    %98 = arith.mulf %97, %97 : vector<2x256xf32>
    %99 = tpu.concatenate %97, %98 in 0 : vector<2x256xf32>, vector<2x256xf32> -> vector<4x256xf32>
    %cst_47 = arith.constant dense<0.000000e+00> : vector<4xf32>
    %100 = vector.multi_reduction <add>, %99, %cst_47 [1] : vector<4x256xf32> to vector<4xf32>
    %101 = vector.shape_cast %100 : vector<4xf32> to vector<4x1xf32>
    %cst_48 = arith.constant 3.906250e-03 : f32
    %102 = vector.broadcast %cst_48 : f32 to vector<4x1xf32>
    %103 = arith.mulf %101, %102 : vector<4x1xf32>
    %104 = vector.extract_strided_slice %103 {offsets = [0, 0], sizes = [2, 1], strides = [1, 1]} : vector<4x1xf32> to vector<2x1xf32>
    %105 = vector.extract_strided_slice %103 {offsets = [2, 0], sizes = [2, 1], strides = [1, 1]} : vector<4x1xf32> to vector<2x1xf32>
    %106 = arith.mulf %104, %104 : vector<2x1xf32>
    %107 = arith.subf %105, %106 : vector<2x1xf32>
    %cst_49 = arith.constant 0.000000e+00 : f32
    %108 = vector.broadcast %cst_49 : f32 to vector<2x1xf32>
    %109 = arith.maximumf %107, %108 : vector<2x1xf32>
    %c20 = arith.constant 20 : index
    %c0_50 = arith.constant 0 : index
    %110 = vector.load %arg3[%c20, %c0_50] : memref<40x256xf32, #tpu.memory_space<vmem>>, vector<2x256xf32>
    %c27 = arith.constant 27 : index
    %c0_51 = arith.constant 0 : index
    %111 = vector.load %arg3[%c27, %c0_51] : memref<40x256xf32, #tpu.memory_space<vmem>>, vector<2x256xf32>
    %112 = vector.broadcast %104 : vector<2x1xf32> to vector<2x256xf32>
    %113 = arith.subf %97, %112 : vector<2x256xf32>
    %cst_52 = arith.constant 9.99999974E-6 : f32
    %114 = vector.broadcast %cst_52 : f32 to vector<2x1xf32>
    %115 = arith.addf %109, %114 : vector<2x1xf32>
    %116 = math.rsqrt %115 : vector<2x1xf32>
    %117 = vector.broadcast %116 : vector<2x1xf32> to vector<2x256xf32>
    %118 = arith.mulf %113, %117 : vector<2x256xf32>
    %119 = arith.mulf %118, %110 : vector<2x256xf32>
    %120 = arith.addf %119, %111 : vector<2x256xf32>
    %121 = arith.addf %120, %62 : vector<2x256xf32>
    %cst_53 = arith.constant 0.000000e+00 : f32
    %122 = vector.broadcast %cst_53 : f32 to vector<2x256xf32>
    %123 = arith.maximumf %121, %122 : vector<2x256xf32>
    %c4 = arith.constant 4 : index
    %c0_54 = arith.constant 0 : index
    %124 = vector.load %arg3[%c4, %c0_54] : memref<40x256xf32, #tpu.memory_space<vmem>>, vector<2x18xf32>
    %c17_i32_55 = arith.constant 17 : i32
    %125 = tpu.dynamic_rotate %123 by %c17_i32_55 dim 1 : vector<2x256xf32>, i32 -> vector<2x256xf32>
    %c8_56 = arith.constant 8 : index
    %c0_57 = arith.constant 0 : index
    %126 = vector.load %arg3[%c8_56, %c0_57] : memref<40x256xf32, #tpu.memory_space<vmem>>, vector<1x256xf32>
    %127 = vector.broadcast %126 : vector<1x256xf32> to vector<2x256xf32>
    %128 = arith.mulf %125, %127 : vector<2x256xf32>
    %c16_i32_58 = arith.constant 16 : i32
    %129 = tpu.dynamic_rotate %123 by %c16_i32_58 dim 1 : vector<2x256xf32>, i32 -> vector<2x256xf32>
    %c9_59 = arith.constant 9 : index
    %c0_60 = arith.constant 0 : index
    %130 = vector.load %arg3[%c9_59, %c0_60] : memref<40x256xf32, #tpu.memory_space<vmem>>, vector<1x256xf32>
    %131 = vector.broadcast %130 : vector<1x256xf32> to vector<2x256xf32>
    %132 = arith.mulf %129, %131 : vector<2x256xf32>
    %c15_i32_61 = arith.constant 15 : i32
    %133 = tpu.dynamic_rotate %123 by %c15_i32_61 dim 1 : vector<2x256xf32>, i32 -> vector<2x256xf32>
    %c10_62 = arith.constant 10 : index
    %c0_63 = arith.constant 0 : index
    %134 = vector.load %arg3[%c10_62, %c0_63] : memref<40x256xf32, #tpu.memory_space<vmem>>, vector<1x256xf32>
    %135 = vector.broadcast %134 : vector<1x256xf32> to vector<2x256xf32>
    %136 = arith.mulf %133, %135 : vector<2x256xf32>
    %c1_i32_64 = arith.constant 1 : i32
    %137 = tpu.dynamic_rotate %123 by %c1_i32_64 dim 1 : vector<2x256xf32>, i32 -> vector<2x256xf32>
    %c11_65 = arith.constant 11 : index
    %c0_66 = arith.constant 0 : index
    %138 = vector.load %arg3[%c11_65, %c0_66] : memref<40x256xf32, #tpu.memory_space<vmem>>, vector<1x256xf32>
    %139 = vector.broadcast %138 : vector<1x256xf32> to vector<2x256xf32>
    %140 = arith.mulf %137, %139 : vector<2x256xf32>
    %c255_i32_67 = arith.constant 255 : i32
    %141 = tpu.dynamic_rotate %123 by %c255_i32_67 dim 1 : vector<2x256xf32>, i32 -> vector<2x256xf32>
    %c13_68 = arith.constant 13 : index
    %c0_69 = arith.constant 0 : index
    %142 = vector.load %arg3[%c13_68, %c0_69] : memref<40x256xf32, #tpu.memory_space<vmem>>, vector<1x256xf32>
    %143 = vector.broadcast %142 : vector<1x256xf32> to vector<2x256xf32>
    %144 = arith.mulf %141, %143 : vector<2x256xf32>
    %c241_i32_70 = arith.constant 241 : i32
    %145 = tpu.dynamic_rotate %123 by %c241_i32_70 dim 1 : vector<2x256xf32>, i32 -> vector<2x256xf32>
    %c14_71 = arith.constant 14 : index
    %c0_72 = arith.constant 0 : index
    %146 = vector.load %arg3[%c14_71, %c0_72] : memref<40x256xf32, #tpu.memory_space<vmem>>, vector<1x256xf32>
    %147 = vector.broadcast %146 : vector<1x256xf32> to vector<2x256xf32>
    %148 = arith.mulf %145, %147 : vector<2x256xf32>
    %c240_i32_73 = arith.constant 240 : i32
    %149 = tpu.dynamic_rotate %123 by %c240_i32_73 dim 1 : vector<2x256xf32>, i32 -> vector<2x256xf32>
    %c15_74 = arith.constant 15 : index
    %c0_75 = arith.constant 0 : index
    %150 = vector.load %arg3[%c15_74, %c0_75] : memref<40x256xf32, #tpu.memory_space<vmem>>, vector<1x256xf32>
    %151 = vector.broadcast %150 : vector<1x256xf32> to vector<2x256xf32>
    %152 = arith.mulf %149, %151 : vector<2x256xf32>
    %c239_i32_76 = arith.constant 239 : i32
    %153 = tpu.dynamic_rotate %123 by %c239_i32_76 dim 1 : vector<2x256xf32>, i32 -> vector<2x256xf32>
    %c16_77 = arith.constant 16 : index
    %c0_78 = arith.constant 0 : index
    %154 = vector.load %arg3[%c16_77, %c0_78] : memref<40x256xf32, #tpu.memory_space<vmem>>, vector<1x256xf32>
    %155 = vector.broadcast %154 : vector<1x256xf32> to vector<2x256xf32>
    %156 = arith.mulf %153, %155 : vector<2x256xf32>
    %157 = tpu.concatenate %128, %132, %136, %140, %123, %144, %148, %152, %156 in 0 : vector<2x256xf32>, vector<2x256xf32>, vector<2x256xf32>, vector<2x256xf32>, vector<2x256xf32>, vector<2x256xf32>, vector<2x256xf32>, vector<2x256xf32>, vector<2x256xf32> -> vector<18x256xf32>
    %cst_79 = arith.constant dense<0.000000e+00> : vector<2x256xf32>
    %158 = tpu.matmul %124, %157, %cst_79 {dimension_numbers = #tpu.dot_dimension_numbers<[1], [0], [0], [1], [0, 0, 1, 1], [], []>} : vector<2x18xf32>, vector<18x256xf32>, vector<2x256xf32> -> vector<2x256xf32>
    %159 = arith.mulf %158, %158 : vector<2x256xf32>
    %160 = tpu.concatenate %158, %159 in 0 : vector<2x256xf32>, vector<2x256xf32> -> vector<4x256xf32>
    %cst_80 = arith.constant dense<0.000000e+00> : vector<4xf32>
    %161 = vector.multi_reduction <add>, %160, %cst_80 [1] : vector<4x256xf32> to vector<4xf32>
    %162 = vector.shape_cast %161 : vector<4xf32> to vector<4x1xf32>
    %cst_81 = arith.constant 3.906250e-03 : f32
    %163 = vector.broadcast %cst_81 : f32 to vector<4x1xf32>
    %164 = arith.mulf %162, %163 : vector<4x1xf32>
    %165 = vector.extract_strided_slice %164 {offsets = [0, 0], sizes = [2, 1], strides = [1, 1]} : vector<4x1xf32> to vector<2x1xf32>
    %166 = vector.extract_strided_slice %164 {offsets = [2, 0], sizes = [2, 1], strides = [1, 1]} : vector<4x1xf32> to vector<2x1xf32>
    %167 = arith.mulf %165, %165 : vector<2x1xf32>
    %168 = arith.subf %166, %167 : vector<2x1xf32>
    %cst_82 = arith.constant 0.000000e+00 : f32
    %169 = vector.broadcast %cst_82 : f32 to vector<2x1xf32>
    %170 = arith.maximumf %168, %169 : vector<2x1xf32>
    %c22 = arith.constant 22 : index
    %c0_83 = arith.constant 0 : index
    %171 = vector.load %arg3[%c22, %c0_83] : memref<40x256xf32, #tpu.memory_space<vmem>>, vector<2x256xf32>
    %c29 = arith.constant 29 : index
    %c0_84 = arith.constant 0 : index
    %172 = vector.load %arg3[%c29, %c0_84] : memref<40x256xf32, #tpu.memory_space<vmem>>, vector<2x256xf32>
    %173 = vector.broadcast %165 : vector<2x1xf32> to vector<2x256xf32>
    %174 = arith.subf %158, %173 : vector<2x256xf32>
    %cst_85 = arith.constant 9.99999974E-6 : f32
    %175 = vector.broadcast %cst_85 : f32 to vector<2x1xf32>
    %176 = arith.addf %170, %175 : vector<2x1xf32>
    %177 = math.rsqrt %176 : vector<2x1xf32>
    %178 = vector.broadcast %177 : vector<2x1xf32> to vector<2x256xf32>
    %179 = arith.mulf %174, %178 : vector<2x256xf32>
    %180 = arith.mulf %179, %171 : vector<2x256xf32>
    %181 = arith.addf %180, %172 : vector<2x256xf32>
    %182 = arith.addf %181, %123 : vector<2x256xf32>
    %cst_86 = arith.constant 0.000000e+00 : f32
    %183 = vector.broadcast %cst_86 : f32 to vector<2x256xf32>
    %184 = arith.maximumf %182, %183 : vector<2x256xf32>
    %c6 = arith.constant 6 : index
    %c0_87 = arith.constant 0 : index
    %185 = vector.load %arg3[%c6, %c0_87] : memref<40x256xf32, #tpu.memory_space<vmem>>, vector<1x18xf32>
    %c17_i32_88 = arith.constant 17 : i32
    %186 = tpu.dynamic_rotate %184 by %c17_i32_88 dim 1 : vector<2x256xf32>, i32 -> vector<2x256xf32>
    %c8_89 = arith.constant 8 : index
    %c0_90 = arith.constant 0 : index
    %187 = vector.load %arg3[%c8_89, %c0_90] : memref<40x256xf32, #tpu.memory_space<vmem>>, vector<1x256xf32>
    %188 = vector.broadcast %187 : vector<1x256xf32> to vector<2x256xf32>
    %189 = arith.mulf %186, %188 : vector<2x256xf32>
    %c16_i32_91 = arith.constant 16 : i32
    %190 = tpu.dynamic_rotate %184 by %c16_i32_91 dim 1 : vector<2x256xf32>, i32 -> vector<2x256xf32>
    %c9_92 = arith.constant 9 : index
    %c0_93 = arith.constant 0 : index
    %191 = vector.load %arg3[%c9_92, %c0_93] : memref<40x256xf32, #tpu.memory_space<vmem>>, vector<1x256xf32>
    %192 = vector.broadcast %191 : vector<1x256xf32> to vector<2x256xf32>
    %193 = arith.mulf %190, %192 : vector<2x256xf32>
    %c15_i32_94 = arith.constant 15 : i32
    %194 = tpu.dynamic_rotate %184 by %c15_i32_94 dim 1 : vector<2x256xf32>, i32 -> vector<2x256xf32>
    %c10_95 = arith.constant 10 : index
    %c0_96 = arith.constant 0 : index
    %195 = vector.load %arg3[%c10_95, %c0_96] : memref<40x256xf32, #tpu.memory_space<vmem>>, vector<1x256xf32>
    %196 = vector.broadcast %195 : vector<1x256xf32> to vector<2x256xf32>
    %197 = arith.mulf %194, %196 : vector<2x256xf32>
    %c1_i32_97 = arith.constant 1 : i32
    %198 = tpu.dynamic_rotate %184 by %c1_i32_97 dim 1 : vector<2x256xf32>, i32 -> vector<2x256xf32>
    %c11_98 = arith.constant 11 : index
    %c0_99 = arith.constant 0 : index
    %199 = vector.load %arg3[%c11_98, %c0_99] : memref<40x256xf32, #tpu.memory_space<vmem>>, vector<1x256xf32>
    %200 = vector.broadcast %199 : vector<1x256xf32> to vector<2x256xf32>
    %201 = arith.mulf %198, %200 : vector<2x256xf32>
    %c255_i32_100 = arith.constant 255 : i32
    %202 = tpu.dynamic_rotate %184 by %c255_i32_100 dim 1 : vector<2x256xf32>, i32 -> vector<2x256xf32>
    %c13_101 = arith.constant 13 : index
    %c0_102 = arith.constant 0 : index
    %203 = vector.load %arg3[%c13_101, %c0_102] : memref<40x256xf32, #tpu.memory_space<vmem>>, vector<1x256xf32>
    %204 = vector.broadcast %203 : vector<1x256xf32> to vector<2x256xf32>
    %205 = arith.mulf %202, %204 : vector<2x256xf32>
    %c241_i32_103 = arith.constant 241 : i32
    %206 = tpu.dynamic_rotate %184 by %c241_i32_103 dim 1 : vector<2x256xf32>, i32 -> vector<2x256xf32>
    %c14_104 = arith.constant 14 : index
    %c0_105 = arith.constant 0 : index
    %207 = vector.load %arg3[%c14_104, %c0_105] : memref<40x256xf32, #tpu.memory_space<vmem>>, vector<1x256xf32>
    %208 = vector.broadcast %207 : vector<1x256xf32> to vector<2x256xf32>
    %209 = arith.mulf %206, %208 : vector<2x256xf32>
    %c240_i32_106 = arith.constant 240 : i32
    %210 = tpu.dynamic_rotate %184 by %c240_i32_106 dim 1 : vector<2x256xf32>, i32 -> vector<2x256xf32>
    %c15_107 = arith.constant 15 : index
    %c0_108 = arith.constant 0 : index
    %211 = vector.load %arg3[%c15_107, %c0_108] : memref<40x256xf32, #tpu.memory_space<vmem>>, vector<1x256xf32>
    %212 = vector.broadcast %211 : vector<1x256xf32> to vector<2x256xf32>
    %213 = arith.mulf %210, %212 : vector<2x256xf32>
    %c239_i32_109 = arith.constant 239 : i32
    %214 = tpu.dynamic_rotate %184 by %c239_i32_109 dim 1 : vector<2x256xf32>, i32 -> vector<2x256xf32>
    %c16_110 = arith.constant 16 : index
    %c0_111 = arith.constant 0 : index
    %215 = vector.load %arg3[%c16_110, %c0_111] : memref<40x256xf32, #tpu.memory_space<vmem>>, vector<1x256xf32>
    %216 = vector.broadcast %215 : vector<1x256xf32> to vector<2x256xf32>
    %217 = arith.mulf %214, %216 : vector<2x256xf32>
    %218 = tpu.concatenate %189, %193, %197, %201, %184, %205, %209, %213, %217 in 0 : vector<2x256xf32>, vector<2x256xf32>, vector<2x256xf32>, vector<2x256xf32>, vector<2x256xf32>, vector<2x256xf32>, vector<2x256xf32>, vector<2x256xf32>, vector<2x256xf32> -> vector<18x256xf32>
    %cst_112 = arith.constant dense<0.000000e+00> : vector<1x256xf32>
    %219 = tpu.matmul %185, %218, %cst_112 {dimension_numbers = #tpu.dot_dimension_numbers<[1], [0], [0], [1], [0, 0, 1, 1], [], []>} : vector<1x18xf32>, vector<18x256xf32>, vector<1x256xf32> -> vector<1x256xf32>
    %c17 = arith.constant 17 : index
    %c0_113 = arith.constant 0 : index
    %220 = vector.load %arg3[%c17, %c0_113] : memref<40x256xf32, #tpu.memory_space<vmem>>, vector<1x256xf32>
    %221 = arith.mulf %219, %219 : vector<1x256xf32>
    %222 = arith.mulf %220, %219 : vector<1x256xf32>
    %223 = tpu.concatenate %219, %221, %222 in 0 : vector<1x256xf32>, vector<1x256xf32>, vector<1x256xf32> -> vector<3x256xf32>
    %cst_114 = arith.constant dense<0.000000e+00> : vector<3xf32>
    %224 = vector.multi_reduction <add>, %223, %cst_114 [1] : vector<3x256xf32> to vector<3xf32>
    %225 = vector.shape_cast %224 : vector<3xf32> to vector<3x1xf32>
    %226 = vector.extract_strided_slice %225 {offsets = [0, 0], sizes = [1, 1], strides = [1, 1]} : vector<3x1xf32> to vector<1x1xf32>
    %cst_115 = arith.constant 3.906250e-03 : f32
    %227 = vector.broadcast %cst_115 : f32 to vector<1x1xf32>
    %228 = arith.mulf %226, %227 : vector<1x1xf32>
    %229 = vector.extract_strided_slice %225 {offsets = [1, 0], sizes = [1, 1], strides = [1, 1]} : vector<3x1xf32> to vector<1x1xf32>
    %cst_116 = arith.constant 3.906250e-03 : f32
    %230 = vector.broadcast %cst_116 : f32 to vector<1x1xf32>
    %231 = arith.mulf %229, %230 : vector<1x1xf32>
    %232 = arith.mulf %228, %228 : vector<1x1xf32>
    %233 = arith.subf %231, %232 : vector<1x1xf32>
    %cst_117 = arith.constant 0.000000e+00 : f32
    %234 = vector.broadcast %cst_117 : f32 to vector<1x1xf32>
    %235 = arith.maximumf %233, %234 : vector<1x1xf32>
    %236 = vector.extract_strided_slice %225 {offsets = [2, 0], sizes = [1, 1], strides = [1, 1]} : vector<3x1xf32> to vector<1x1xf32>
    %c24 = arith.constant 24 : index
    %c0_118 = arith.constant 0 : index
    %237 = vector.load %arg3[%c24, %c0_118] : memref<40x256xf32, #tpu.memory_space<vmem>>, vector<1x1xf32>
    %c31 = arith.constant 31 : index
    %c0_119 = arith.constant 0 : index
    %238 = vector.load %arg3[%c31, %c0_119] : memref<40x256xf32, #tpu.memory_space<vmem>>, vector<1x1xf32>
    %c33 = arith.constant 33 : index
    %c0_120 = arith.constant 0 : index
    %239 = vector.load %arg3[%c33, %c0_120] : memref<40x256xf32, #tpu.memory_space<vmem>>, vector<1x1xf32>
    %c32 = arith.constant 32 : index
    %c0_121 = arith.constant 0 : index
    %240 = vector.load %arg3[%c32, %c0_121] : memref<40x256xf32, #tpu.memory_space<vmem>>, vector<1x1xf32>
    %cst_122 = arith.constant 9.99999974E-6 : f32
    %241 = vector.broadcast %cst_122 : f32 to vector<1x1xf32>
    %242 = arith.addf %235, %241 : vector<1x1xf32>
    %243 = math.rsqrt %242 : vector<1x1xf32>
    %244 = arith.mulf %237, %243 : vector<1x1xf32>
    %245 = arith.mulf %244, %236 : vector<1x1xf32>
    %246 = arith.mulf %244, %228 : vector<1x1xf32>
    %247 = arith.mulf %246, %239 : vector<1x1xf32>
    %248 = arith.subf %245, %247 : vector<1x1xf32>
    %249 = arith.mulf %238, %239 : vector<1x1xf32>
    %250 = arith.addf %248, %249 : vector<1x1xf32>
    %251 = arith.addf %250, %240 : vector<1x1xf32>
    %252 = math.tanh %251 : vector<1x1xf32>
    %253 = vector.shape_cast %252 : vector<1x1xf32> to vector<1x1xf32>
    %254 = vector.broadcast %253 : vector<1x1xf32> to vector<1x256xf32>
    %255 = tpu.concatenate %184, %254 in 0 : vector<2x256xf32>, vector<1x256xf32> -> vector<3x256xf32>
    %c0_123 = arith.constant 0 : index
    %c0_124 = arith.constant 0 : index
    %c0_125 = arith.constant 0 : index
    %256 = vector.load %arg4[%c0_123, %c0_124, %c0_125] : memref<1x3x256xf32, #tpu.memory_space<vmem>>, vector<1x3x256xf32>
    %257 = vector.shape_cast %256 : vector<1x3x256xf32> to vector<3x256xf32>
    %258 = vector.shape_cast %255 : vector<3x256xf32> to vector<1x3x256xf32>
    tpu.vector_store %arg4[%c0_123, %c0_124, %c0_125], %258 {strides = array<i32>} : memref<1x3x256xf32, #tpu.memory_space<vmem>>, vector<1x3x256xf32>,
    return
  }
  func.func @transform_0(%arg0: i32) -> (i32, i32, i32) {
    %c0_i32 = arith.constant 0 : i32
    %c0_i32_0 = arith.constant 0 : i32
    %c0_i32_1 = arith.constant 0 : i32
    return %arg0, %c0_i32, %c0_i32_0 : i32, i32, i32
  }
  func.func @transform_1(%arg0: i32) -> (i32, i32, i32) {
    %c0_i32 = arith.constant 0 : i32
    %c0_i32_0 = arith.constant 0 : i32
    %c0_i32_1 = arith.constant 0 : i32
    return %arg0, %c0_i32, %c0_i32_0 : i32, i32, i32
  }
  func.func @transform_2(%arg0: i32) -> (i32, i32) {
    %c0_i32 = arith.constant 0 : i32
    %c0_i32_0 = arith.constant 0 : i32
    %c0_i32_1 = arith.constant 0 : i32
    return %c0_i32, %c0_i32_0 : i32, i32
  }
  func.func @transform_3(%arg0: i32) -> (i32, i32, i32) {
    %c0_i32 = arith.constant 0 : i32
    %c0_i32_0 = arith.constant 0 : i32
    %c0_i32_1 = arith.constant 0 : i32
    return %arg0, %c0_i32, %c0_i32_0 : i32, i32, i32
  }
}

</mosaic_0001>

<bundles_post_ra>
// kernel: dynamics_forward_batched.1
= control target key start
LH: loop header
LB: loop body
LE: loop exit
PB: predicated region body
PF: predicated region fallthrough
CT: control target
= control target key end

     0   :  { %8 = vsyncpa [#allocation3], 0  ;;  %s1283_s12 = smov [#allocation2]   ;;  %s1836_s0 = inlined_call_operand.vmem [shape: f32[1,2,256], index: 0, kind: input, shape index: {}]   ;;  %s1837_s1 = inlined_call_operand.vmem [shape: f32[1,2,256], index: 1, kind: input, shape index: {}]   ;;  %s1838_s2 = inlined_call_operand.hbm [shape: f32[40,256], index: 2, kind: input, shape index: {}]   ;;  %s1839_s3 = inlined_call_operand.vmem [shape: f32[1,3,256], index: 3, kind: output, shape index: {}]  }
   0x1   :  { %s18_s13 = sshll.u32 %s1283_s12, 4  ;;  %s1259_s16 = scalar_lea.hbm %s1838_s2, 1280  ;;  %s19_s13 = int_to_ptr.vmem [resolvable:$true] %s18_s13 }
   0x2   :  { %p1260_p0 = scmp.ne.s32.totalorder %s1838_s2, %s1259_s16  ;;  %p1263_p1 = scmp.lt.u32.totalorder %s1259_s16, %s1838_s2 }
   0x4   :  { %p1265_p2 = pnand %p1263_p1, %p1260_p0 }
   0x6   :  { %1268 = shalt.err (!%p1265_p2)
}
   0x7   :  { %s1269_s21 = scalar_lea.vmem %s19_s13, 1280  ;;  %p1274_p4 = scmp.lt.s32.totalorder %s19_s13, %s19_s13 }
   0x8   :  { %p1270_p3 = scmp.ne.s32.totalorder %s19_s13, %s1269_s21  ;;  %p1275_p5 = scmp.lt.s32.totalorder %s1269_s21, %s1269_s21 }
   0xa   :  { %p1276_p6 = por %p1275_p5, %p1274_p4 }
   0xc   :  { %p1277_p7 = pnand %p1276_p6, %p1270_p3 }
   0xe   :  { %1280 = shalt.err (!%p1277_p7)
}
   0xf   :  { %s1284_s22 = smov 256   ;;  %s1285_s23 = smov 16  }
  0x10   :  { %24 = dma.hbm_to_vmem [thread:$0]  %s1838_s2, 1280, %s19_s13, [#allocation3], %s1284_s22, %s1284_s22, %s1285_s23  }
  0x11   :  { %1281 = dma.done.wait [#allocation3], 1280  }
  0x12   :  { %1282 = vsyncadd [#allocation3], 4294966016  ;;  %v46_v0 = vlaneseq  ;;  %v1286_v1 = vmov 1983009808   ;;  %v1248_v6 = vld [vmem:[%s1837_s1] ss:$0 sps:$4 sm:$0xff]  }
  0x13   :  { %v44_v2 = vunpack.c.l.s4 %v1286_v1  ;;  %v1199_v7 = vld.sshfl [vmem:[%s1836_s0] sm:$0x33 pattern:$0x76325410]  ;;  %vm53_vm0 = vcmask 1041408   ;;  %s1287_s2 = smov 1  }
  0x14   :  { %v1330_v3 = vshrl.u32 %v46_v0, 7  ;;  %v38_v9 = vcombine.high %v1199_v7, %v1199_v7  ;;  %s1288_s1 = smov 17   ;;  %s1289_s0 = smov 15   ;;  %v1292_v13 = vmov 0.0   ;;  %v1379_v16 = vand.u32 127, %v46_v0 }
  0x15   :  { %v45_v4 = vunpack.c.0.s8 %v44_v2  ;;  %s1290_s30 = smov 127   ;;  %s1291_s4 = smov 112   ;;  %342 = vmatprep.mubr.f32.mxu0 %v1292_v13  ;;  %592 = vmatprep.mubr.f32.mxu1 %v1292_v13  ;;  %v133_v20 = vld [vmem:[#allocation2 + $0x13] ss:$8 sm:$0x3]  ;;  %vm259_vm5 = vcmask 1043456  }
  0x16   :  { %s1293_s5 = smov 113   ;;  %s1294_s6 = smov 111   ;;  %v1382_v17 = vsub.s32 0, %v1330_v3  ;;  %v1385_v18 = vsub.s32 1, %v1330_v3  ;;  %vm129_vm1 = vcmp.lt.s32.totalorder %v1379_v16, 1  ;;  %vm63_vm2 = vcmp.lt.s32.totalorder %v1379_v16, 17 }
  0x17   :  { %v48_v5 = vsub.s32 %v45_v4, %v1330_v3  ;;  %v67_v22 = vld [vmem:[#allocation2 + $0x10] ss:$8 sm:$0x3]  ;;  %v111_v23 = vld [vmem:[#allocation2 + $0x12] ss:$8 sm:$0x3] }
  0x18   :  { %v1389_v24 = vrot.slane %v133_v20, %v1382_v17  ;;  %v1392_v25 = vrot.slane %v133_v20, %v1385_v18  ;;  %v89_v26 = vld [vmem:[#allocation2 + $0x11] ss:$8 sm:$0x3]  ;;  %v1400_v31 = vrot.slane %v67_v22, %v1382_v17  ;;  %vm107_vm3 = vcmp.lt.s32.totalorder %v1379_v16, 15 }
  0x19   :  { %v49_v8 = vrot.slane %v1248_v6, %v48_v5  ;;  %v1404_v32 = vrot.slane %v111_v23, %v1382_v17  ;;  %v155_v33 = vld [vmem:[#allocation2 + $0x15] ss:$8 sm:$0x3]  ;;  %v1407_v34 = vrot.slane %v111_v23, %v1385_v18  ;;  %vm85_vm4 = vcmp.lt.s32.totalorder %v1379_v16, 16 }
  0x1a   :  { %v1411_v35 = vrot.slane %v89_v26, %v1382_v17  ;;  %v1414_v36 = vrot.slane %v89_v26, %v1385_v18  ;;  %v1419_v39 = vrot.slane %v67_v22, %v1385_v18  ;;  %vm151_vm6 = vcmp.lt.s32.totalorder %v1379_v16, 127  ;;  %v199_v53 = vld [vmem:[#allocation2 + $0x17] ss:$8 sm:$0x3] }
  0x1b   :  { %v1340_v10 = vsel %vm53_vm0, %v1199_v7, %v49_v8  ;;  %v50_v11 = vcombine.high %v49_v8, %v49_v8  ;;  %v1427_v44 = vrot.slane %v155_v33, %v1382_v17  ;;  %v1442_v56 = vrot.slane %v155_v33, %v1385_v18 }
  0x1c   :  { %125 = vrot.lane.b32.xlu1 %v1340_v10, %s1287_s2  ;;  %81 = vrot.lane.b32.xlu0 %v1340_v10, %s1285_s23  ;;  %vm195_vm7 = vcmp.lt.s32.totalorder %v1379_v16, 112  ;;  %v1452_v1 = vrot.slane %v199_v53, %v1382_v17  ;;  %v1455_v2 = vrot.slane %v199_v53, %v1385_v18  ;;  %vm173_vm8 = vcmp.lt.s32.totalorder %v1379_v16, 113 }
  0x1d   :  { %v1347_v12 = vsel %vm53_vm0, %v38_v9, %v50_v11  ;;  %v177_v11 = vld [vmem:[#allocation2 + $0x16] ss:$8 sm:$0x3]  ;;  %vm217_vm9 = vcmp.lt.s32.totalorder %v1379_v16, 111  ;;  %vm268_vm10 = vcmask 293888   ;;  %vm508_vm11 = vcmask 1045504  }
  0x1e   :  { %vm519_vm12 = vcmask 146432   ;;  %vm1142_vm13 = vcmask 1040384   ;;  %vm1147_vm14 = vcmask 1042432  }
  0x20   :  { %57 = vrot.lane.b32.xlu0 %v1340_v10, %s1288_s1  ;;  %127 = vrot.lane.b32.xlu1 %v1347_v12, %s1287_s2 }
  0x24   :  { %103 = vrot.lane.b32.xlu0 %v1340_v10, %s1289_s0  ;;  %59 = vrot.lane.b32.xlu1 %v1347_v12, %s1288_s1 }
  0x28   :  { %105 = vrot.lane.b32.xlu1 %v1347_v12, %s1289_s0  ;;  %83 = vrot.lane.b32.xlu0 %v1347_v12, %s1285_s23 }
  0x2c   :  { %149 = vrot.lane.b32.xlu1 %v1347_v12, %s1290_s30  ;;  %147 = vrot.lane.b32.xlu0 %v1340_v10, %s1290_s30 }
  0x30   :  { %193 = vrot.lane.b32.xlu1 %v1347_v12, %s1291_s4  ;;  %191 = vrot.lane.b32.xlu0 %v1340_v10, %s1291_s4 }
  0x34   :  { %171 = vrot.lane.b32.xlu1 %v1347_v12, %s1293_s5  ;;  %169 = vrot.lane.b32.xlu0 %v1340_v10, %s1293_s5 }
  0x38   :  { %215 = vrot.lane.b32.xlu1 %v1347_v12, %s1294_s6  ;;  %213 = vrot.lane.b32.xlu0 %v1340_v10, %s1294_s6 }
  0x8e   :  { %v126_v14 = vpop.permute.xlu1 %125  ;;  %v82_v15 = vpop.permute.xlu0 %81 }
  0x92   :  { %v58_v19 = vpop.permute.xlu0 %57  ;;  %v128_v21 = vpop.permute.xlu1 %127 }
  0x93   :  { %v130_v27 = vsel %vm129_vm1, %v126_v14, %v128_v21  ;;  %v131_v28 = vsel %vm129_vm1, %v128_v21, %v126_v14 }
  0x94   :  { %v145_v37 = vmul.f32 %v1389_v24, %v131_v28  ;;  %v146_v38 = vmul.f32 %v1392_v25, %v130_v27  ;;  %v1471_v27 = vrot.slane %v177_v11, %v1382_v17  ;;  %v1474_v28 = vrot.slane %v177_v11, %v1385_v18 }
  0x96   :  { %v104_v29 = vpop.permute.xlu0 %103  ;;  %v60_v30 = vpop.permute.xlu1 %59  ;;  %v243_v54 = vrot.slane %v145_v37, 4  ;;  %v244_v55 = vrot.slane %v146_v38, 4 }
  0x97   :  { %v64_v40 = vsel %vm63_vm2, %v58_v19, %v60_v30  ;;  %v65_v41 = vsel %vm63_vm2, %v60_v30, %v58_v19 }
  0x98   :  { %v79_v57 = vmul.f32 %v1400_v31, %v65_v41  ;;  %v80_v58 = vmul.f32 %v1419_v39, %v64_v40 }
  0x9a   :  { %v106_v42 = vpop.permute.xlu1 %105  ;;  %v84_v43 = vpop.permute.xlu0 %83 }
  0x9b   :  { %v108_v45 = vsel %vm107_vm3, %v104_v29, %v106_v42  ;;  %v109_v46 = vsel %vm107_vm3, %v106_v42, %v104_v29  ;;  %v86_v47 = vsel %vm85_vm4, %v82_v15, %v84_v43  ;;  %v87_v48 = vsel %vm85_vm4, %v84_v43, %v82_v15  ;;  %v221_v29 = vld [vmem:[#allocation2 + $0x20] ss:$8 sm:$0x3] }
  0x9c   :  { %v123_v49 = vmul.f32 %v1404_v32, %v109_v46  ;;  %v124_v50 = vmul.f32 %v1407_v34, %v108_v45  ;;  %v101_v51 = vmul.f32 %v1411_v35, %v87_v48  ;;  %v102_v52 = vmul.f32 %v1414_v36, %v86_v47 }
  0x9d   :  { %v1482_v42 = vrot.slane %v221_v29, %v1385_v18  ;;  %v1487_v48 = vrot.slane %v221_v29, %v1382_v17 }
  0x9e   :  { %v237_v59 = vrot.slane %v101_v51, 4  ;;  %v238_v60 = vrot.slane %v102_v52, 4  ;;  %v150_v61 = vpop.permute.xlu1 %149  ;;  %v148_v62 = vpop.permute.xlu0 %147  ;;  %v263_v5 = vsel %vm259_vm5, %v124_v50, %v244_v55  ;;  %v262_v7 = vsel %vm259_vm5, %v123_v49, %v243_v54 }
  0x9f   :  { %v152_v63 = vsel %vm151_vm6, %v148_v62, %v150_v61  ;;  %v153_v0 = vsel %vm151_vm6, %v150_v61, %v148_v62  ;;  %v56_v61 = vld [vmem:[#allocation2] sm:$0x3] }
  0xa0   :  { %v261_v4 = vsel %vm259_vm5, %v80_v58, %v238_v60  ;;  %v260_v6 = vsel %vm259_vm5, %v79_v57, %v237_v59  ;;  %v167_v14 = vmul.f32 %v1427_v44, %v152_v63  ;;  %v168_v15 = vmul.f32 %v1442_v56, %v153_v0 }
  0xa1   :  { %v1212_v8 = vpack.c.bf16 %v263_v5, %v261_v4  ;;  %v1214_v9 = vpack.c.bf16 %v262_v7, %v260_v6 }
  0xa2   :  { %v194_v19 = vpop.permute.xlu1 %193  ;;  %v192_v20 = vpop.permute.xlu0 %191  ;;  %v249_v30 = vrot.slane %v167_v14, 4  ;;  %v250_v33 = vrot.slane %v168_v15, 4  ;;  %v1295_v14 = vmov 0  }
  0xa3   :  { %v196_v21 = vsel %vm195_vm7, %v192_v20, %v194_v19  ;;  %v197_v22 = vsel %vm195_vm7, %v194_v19, %v192_v20  ;;  %1213 = vmatprep.subr.bf16.mxu0 %v1212_v8  ;;  %1246 = vset.pattern.permute.xlu1 %v1295_v14 }
  0xa4   :  { %v211_v23 = vmul.f32 %v1452_v1, %v196_v21  ;;  %v212_v26 = vmul.f32 %v1455_v2, %v197_v22  ;;  %1215 = vmatpush1.bf16.msra.mxu0 %v1214_v9  ;;  %v265_v50 = vsel %vm259_vm5, %v1347_v12, %v250_v33  ;;  %v264_v53 = vsel %vm259_vm5, %v1340_v10, %v249_v30 }
  0xa5   :  { %1247 = vset.pattern.permute.xlu0 %v1295_v14 }
  0xa6   :  { %v172_v37 = vpop.permute.xlu1 %171  ;;  %v170_v38 = vpop.permute.xlu0 %169  ;;  %v255_v43 = vrot.slane %v211_v23, 4  ;;  %v256_v45 = vrot.slane %v212_v26, 4 }
  0xa7   :  { %v174_v40 = vsel %vm173_vm8, %v170_v38, %v172_v37  ;;  %v175_v41 = vsel %vm173_vm8, %v172_v37, %v170_v38  ;;  %v371_v37 = vld [vmem:[#allocation2 + $0x20] sm:$0xc]  ;;  %v372_v38 = vld [vmem:[#allocation2 + $0x28] sm:$0xc] }
  0xa8   :  { %v189_v46 = vmul.f32 %v1471_v27, %v174_v40  ;;  %v190_v47 = vmul.f32 %v1474_v28, %v175_v41  ;;  %v373_v40 = vld [vmem:[#allocation2 + $0x30] sm:$0x6]  ;;  %v374_v41 = vld [vmem:[#allocation2 + $0x38] sm:$0x6] }
  0xaa   :  { %v216_v49 = vpop.permute.xlu1 %215  ;;  %v267_v51 = vsel %vm259_vm5, %v190_v47, %v256_v45  ;;  %v214_v52 = vpop.permute.xlu0 %213  ;;  %v266_v54 = vsel %vm259_vm5, %v189_v46, %v255_v43  ;;  %v389_v45 = vrot.slane %v371_v37, 2  ;;  %v390_v46 = vrot.slane %v372_v38, 2 }
  0xab   :  { %v1216_v55 = vpack.c.bf16 %v267_v51, %v265_v50  ;;  %v218_v57 = vsel %vm217_vm9, %v214_v52, %v216_v49  ;;  %v219_v58 = vsel %vm217_vm9, %v216_v49, %v214_v52  ;;  %v1218_v59 = vpack.c.bf16 %v266_v54, %v264_v53 }
  0xac   :  { %v234_v60 = vmul.f32 %v1482_v42, %v219_v58  ;;  %v233_v12 = vmul.f32 %v1487_v48, %v218_v57  ;;  %v397_v49 = vrot.slane %v373_v40, 1  ;;  %v398_v50 = vrot.slane %v374_v41, 1 }
  0xad   :  { %1217 = vmatprep.subr.bf16.mxu0 %v1216_v55 }
  0xae   :  { %1219 = vmatpush1.bf16.msra.mxu0 %v1218_v59 }
  0xaf   :  { %1200 = vmatprep.subr.msk.mxu0 %vm259_vm5, %v234_v60 }
  0xb2   :  { %1201 = vmatpush1.msk.msra.mxu0 %vm259_vm5, %v233_v12 }
  0xb3   :  { %1202 = vmatmul.mubr.msk.f32.vlgmr.msra.gmra.mrb[0].mxu0 %vm268_vm10, %v56_v61 }
  0xb4   :  { %1095 = vmatprep.mubr.f32.mxu0 %v1292_v13 }
 0x186   :  { %v344_v10 = vpop.f32.mrb[0].mxu0 }
 0x187   :  { %v349_v62 = vmul.f32 %v344_v10, %v344_v10  ;;  %v346_v63 = vpop.f32.mrb[1].mxu0 }
 0x188   :  { %v350_v0 = vmul.f32 %v346_v63, %v346_v63 }
 0x189   :  { %v353_v4 = vrot.slane %v349_v62, 6 }
 0x18a   :  { %v354_v5 = vrot.slane %v350_v0, 6 }
 0x18b   :  { %v357_v6 = vsel %vm53_vm0, %v344_v10, %v353_v4 }
 0x18c   :  { %v358_v7 = vsel %vm53_vm0, %v346_v63, %v354_v5  ;;  %v359_v8 = vsel %vm259_vm5, %v357_v6, 0.0 }
 0x18d   :  { %v360_v9 = vsel %vm259_vm5, %v358_v7, 0.0 }
 0x18e   :  { %v361_v11 = vadd.f32 %v360_v9, %v359_v8 }
 0x190   :  { %362 = vadd.xlane.f32.xlu0 %v361_v11 }
 0x21d   :  { %v363_v15 = vpop.xlane.xlu0 %362 }
 0x21e   :  { %v364_v19 = vmul.f32 0.00390625, %v363_v15 }
 0x220   :  { %v365_v20 = vmul.f32 %v364_v19, %v364_v19  ;;  %v375_v21 = vsub.f32 %v344_v10, %v364_v19  ;;  %v376_v22 = vsub.f32 %v346_v63, %v364_v19 }
 0x222   :  { %v367_v23 = vrot.slane %v365_v20, 6 }
 0x224   :  { %v369_v26 = vsub.f32 %v364_v19, %v367_v23 }
 0x226   :  { %v370_v29 = vmax.f32 %v369_v26, 0.0 }
 0x228   :  { %v377_v30 = vadd.f32 1e-05, %v370_v29 }
 0x22a   :  { %1249 = vrsqrt.f32 %v377_v30 }
 0x234   :  { %v1250_v33 = vpop.eup %1249 }
 0x235   :  { %381 = vperm.xlu1 %1246, %v1250_v33  }
 0x2b4   :  { %v382_v43 = vpop.permute.xlu1 %381 }
 0x2b5   :  { %v383_v47 = vrot.slane %v382_v43, 2 }
 0x2b7   :  { %v385_v51 = vmul.f32 %v383_v47, %v375_v21  ;;  %v386_v52 = vmul.f32 %v383_v47, %v376_v22 }
 0x2b9   :  { %v393_v53 = vmul.f32 %v389_v45, %v385_v51  ;;  %v394_v54 = vmul.f32 %v390_v46, %v386_v52 }
 0x2bb   :  { %v1508_v55 = vadd.f32 %v397_v49, %v393_v53  ;;  %v1510_v57 = vadd.f32 %v398_v50, %v394_v54 }
 0x2bd   :  { %446 = vrot.lane.b32.xlu0 %v1510_v57, %s1293_s5  ;;  %412 = vrot.lane.b32.xlu1 %v1508_v55, %s1285_s23 }
 0x2c1   :  { %460 = vrot.lane.b32.xlu0 %v1508_v55, %s1294_s6  ;;  %414 = vrot.lane.b32.xlu1 %v1510_v57, %s1285_s23 }
 0x2c5   :  { %436 = vrot.lane.b32.xlu1 %v1508_v55, %s1290_s30 }
 0x2c9   :  { %438 = vrot.lane.b32.xlu1 %v1510_v57, %s1290_s30 }
 0x2cd   :  { %420 = vrot.lane.b32.xlu1 %v1508_v55, %s1289_s0 }
 0x2d1   :  { %422 = vrot.lane.b32.xlu1 %v1510_v57, %s1289_s0 }
 0x2d5   :  { %444 = vrot.lane.b32.xlu1 %v1508_v55, %s1293_s5 }
 0x2d9   :  { %404 = vrot.lane.b32.xlu1 %v1508_v55, %s1288_s1 }
 0x2dd   :  { %406 = vrot.lane.b32.xlu1 %v1510_v57, %s1288_s1 }
 0x2e1   :  { %428 = vrot.lane.b32.xlu1 %v1508_v55, %s1287_s2 }
 0x2e5   :  { %430 = vrot.lane.b32.xlu1 %v1510_v57, %s1287_s2 }
 0x2e9   :  { %452 = vrot.lane.b32.xlu1 %v1508_v55, %s1291_s4 }
 0x2ed   :  { %454 = vrot.lane.b32.xlu1 %v1510_v57, %s1291_s4 }
 0x2f1   :  { %462 = vrot.lane.b32.xlu1 %v1510_v57, %s1294_s6 }
 0x32f   :  { %v413_v58 = vpop.permute.xlu1 %412  ;;  %v447_v7 = vpop.permute.xlu0 %446 }
 0x333   :  { %v415_v59 = vpop.permute.xlu1 %414 }
 0x334   :  { %v416_v5 = vsel %vm85_vm4, %v413_v58, %v415_v59  ;;  %v417_v6 = vsel %vm85_vm4, %v415_v59, %v413_v58 }
 0x335   :  { %v418_v20 = vmul.f32 %v417_v6, %v1411_v35  ;;  %v419_v21 = vmul.f32 %v416_v5, %v1414_v36 }
 0x337   :  { %v437_v60 = vpop.permute.xlu1 %436  ;;  %v470_v50 = vrot.slane %v418_v20, 6  ;;  %v471_v51 = vrot.slane %v419_v21, 6  ;;  %v461_v20 = vpop.permute.xlu0 %460 }
 0x33b   :  { %v439_v12 = vpop.permute.xlu1 %438 }
 0x33c   :  { %v440_v8 = vsel %vm151_vm6, %v437_v60, %v439_v12  ;;  %v441_v9 = vsel %vm151_vm6, %v439_v12, %v437_v60 }
 0x33d   :  { %v442_v26 = vmul.f32 %v440_v8, %v1427_v44  ;;  %v443_v29 = vmul.f32 %v441_v9, %v1442_v56 }
 0x33f   :  { %v421_v61 = vpop.permute.xlu1 %420  ;;  %v489_v52 = vrot.slane %v443_v29, 6  ;;  %v488_v54 = vrot.slane %v442_v26, 6 }
 0x341   :  { %v512_v8 = vsel %vm53_vm0, %v1510_v57, %v489_v52 }
 0x343   :  { %v423_v10 = vpop.permute.xlu1 %422 }
 0x344   :  { %v424_v14 = vsel %vm107_vm3, %v421_v61, %v423_v10  ;;  %v425_v37 = vsel %vm107_vm3, %v423_v10, %v421_v61 }
 0x345   :  { %v427_v38 = vmul.f32 %v424_v14, %v1407_v34  ;;  %v426_v53 = vmul.f32 %v425_v37, %v1404_v32 }
 0x347   :  { %v445_v62 = vpop.permute.xlu1 %444  ;;  %v477_v58 = vrot.slane %v427_v38, 4 }
 0x348   :  { %v448_v15 = vsel %vm173_vm8, %v445_v62, %v447_v7  ;;  %v449_v19 = vsel %vm173_vm8, %v447_v7, %v445_v62  ;;  %v476_v7 = vrot.slane %v426_v53, 4 }
 0x349   :  { %v450_v40 = vmul.f32 %v448_v15, %v1471_v27  ;;  %v451_v41 = vmul.f32 %v449_v19, %v1474_v28  ;;  %v511_v19 = vsel %vm53_vm0, %v1508_v55, %v488_v54 }
 0x34b   :  { %v405_v63 = vpop.permute.xlu1 %404  ;;  %v494_v59 = vrot.slane %v450_v40, 4  ;;  %v495_v60 = vrot.slane %v451_v41, 4  ;;  %v403_v41 = vld [vmem:[#allocation2] sm:$0xc] }
 0x34d   :  { %v513_v26 = vsel %vm259_vm5, %v511_v19, %v494_v59 }
 0x34f   :  { %v407_v0 = vpop.permute.xlu1 %406 }
 0x350   :  { %v408_v22 = vsel %vm63_vm2, %v405_v63, %v407_v0  ;;  %v409_v30 = vsel %vm63_vm2, %v407_v0, %v405_v63 }
 0x351   :  { %v411_v45 = vmul.f32 %v408_v22, %v1419_v39  ;;  %v410_v47 = vmul.f32 %v409_v30, %v1400_v31  ;;  %v514_v22 = vsel %vm259_vm5, %v512_v8, %v495_v60 }
 0x353   :  { %v429_v4 = vpop.permute.xlu1 %428  ;;  %v505_v63 = vsel %vm53_vm0, %v411_v45, %v471_v51  ;;  %v504_v6 = vsel %vm53_vm0, %v410_v47, %v470_v50 }
 0x354   :  { %v507_v15 = vsel %vm259_vm5, %v505_v63, %v477_v58 }
 0x357   :  { %v431_v11 = vpop.permute.xlu1 %430 }
 0x358   :  { %v432_v23 = vsel %vm129_vm1, %v429_v4, %v431_v11  ;;  %v433_v33 = vsel %vm129_vm1, %v431_v11, %v429_v4 }
 0x359   :  { %v435_v46 = vmul.f32 %v432_v23, %v1392_v25  ;;  %v434_v49 = vmul.f32 %v433_v33, %v1389_v24  ;;  %v506_v23 = vsel %vm259_vm5, %v504_v6, %v476_v7 }
 0x35b   :  { %v453_v43 = vpop.permute.xlu1 %452  ;;  %v483_v61 = vrot.slane %v435_v46, 2  ;;  %v482_v0 = vrot.slane %v434_v49, 2  ;;  %v518_v46 = vrot.slane %v403_v41, 2 }
 0x35d   :  { %v510_v21 = vsel %vm508_vm11, %v507_v15, %v483_v61  ;;  %v509_v33 = vsel %vm508_vm11, %v506_v23, %v482_v0  ;;  %v624_v15 = vld [vmem:[#allocation2 + $0x38] sm:$0x18] }
 0x35f   :  { %v455_v12 = vpop.permute.xlu1 %454 }
 0x360   :  { %v456_v10 = vsel %vm195_vm7, %v453_v43, %v455_v12  ;;  %v457_v62 = vsel %vm195_vm7, %v455_v12, %v453_v43 }
 0x361   :  { %v458_v4 = vmul.f32 %v456_v10, %v1452_v1  ;;  %v459_v5 = vmul.f32 %v457_v62, %v1455_v2 }
 0x363   :  { %v500_v9 = vrot.slane %v458_v4, 2  ;;  %v501_v11 = vrot.slane %v459_v5, 2  ;;  %v463_v14 = vpop.permute.xlu1 %462 }
 0x364   :  { %v465_v29 = vsel %vm217_vm9, %v463_v14, %v461_v20  ;;  %v464_v43 = vsel %vm217_vm9, %v461_v20, %v463_v14  ;;  %v623_v14 = vld [vmem:[#allocation2 + $0x30] sm:$0x18] }
 0x365   :  { %v516_v30 = vsel %vm508_vm11, %v514_v22, %v501_v11  ;;  %v515_v37 = vsel %vm508_vm11, %v513_v26, %v500_v9  ;;  %v467_v45 = vmul.f32 %v465_v29, %v1482_v42  ;;  %v466_v47 = vmul.f32 %v464_v43, %v1487_v48  ;;  %v621_v9 = vld [vmem:[#allocation2 + $0x20] sm:$0x30]  ;;  %v622_v11 = vld [vmem:[#allocation2 + $0x28] sm:$0x30] }
 0x366   :  { %v1220_v38 = vpack.c.bf16 %v516_v30, %v510_v21  ;;  %v1222_v40 = vpack.c.bf16 %v515_v37, %v509_v33  ;;  %v639_v20 = vrot.slane %v621_v9, 4  ;;  %v640_v21 = vrot.slane %v622_v11, 4 }
 0x367   :  { %v647_v23 = vrot.slane %v623_v14, 3  ;;  %v648_v26 = vrot.slane %v624_v15, 3 }
 0x368   :  { %1221 = vmatprep.subr.bf16.mxu1 %v1220_v38 }
 0x369   :  { %1223 = vmatpush1.bf16.msra.mxu1 %v1222_v40 }
 0x36a   :  { %1203 = vmatprep.subr.msk.mxu1 %vm53_vm0, %v467_v45 }
 0x36d   :  { %1204 = vmatpush1.msk.msra.mxu1 %vm53_vm0, %v466_v47 }
 0x36e   :  { %1205 = vmatmul.mubr.msk.f32.vlgmr.msra.gmra.mrb[0].mxu1 %vm519_vm12, %v518_v46 }
 0x36f   :  { %844 = vmatprep.mubr.f32.mxu1 %v1292_v13 }
 0x441   :  { %v594_v49 = vpop.f32.mrb[0].mxu1 }
 0x442   :  { %v599_v50 = vmul.f32 %v594_v49, %v594_v49  ;;  %v596_v51 = vpop.f32.mrb[1].mxu1 }
 0x443   :  { %v600_v52 = vmul.f32 %v596_v51, %v596_v51 }
 0x444   :  { %v603_v53 = vrot.slane %v599_v50, 6 }
 0x445   :  { %v604_v54 = vrot.slane %v600_v52, 6 }
 0x446   :  { %v607_v58 = vsel %vm53_vm0, %v594_v49, %v603_v53 }
 0x447   :  { %v608_v59 = vsel %vm53_vm0, %v596_v51, %v604_v54  ;;  %v609_v60 = vsel %vm259_vm5, %v607_v58, 0.0 }
 0x448   :  { %v610_v12 = vsel %vm259_vm5, %v608_v59, 0.0 }
 0x449   :  { %v611_v61 = vadd.f32 %v610_v12, %v609_v60 }
 0x44b   :  { %612 = vadd.xlane.f32.xlu0 %v611_v61 }
 0x4d8   :  { %v613_v10 = vpop.xlane.xlu0 %612 }
 0x4d9   :  { %v614_v62 = vmul.f32 0.00390625, %v613_v10 }
 0x4db   :  { %v615_v63 = vmul.f32 %v614_v62, %v614_v62  ;;  %v625_v13 = vsub.f32 %v594_v49, %v614_v62  ;;  %v626_v0 = vsub.f32 %v596_v51, %v614_v62 }
 0x4dd   :  { %v617_v4 = vrot.slane %v615_v63, 6 }
 0x4df   :  { %v619_v5 = vsub.f32 %v614_v62, %v617_v4 }
 0x4e1   :  { %v620_v6 = vmax.f32 %v619_v5, 0.0 }
 0x4e3   :  { %v627_v7 = vadd.f32 1e-05, %v620_v6 }
 0x4e5   :  { %1251 = vrsqrt.f32 %v627_v7 }
 0x4ef   :  { %v1252_v8 = vpop.eup %1251 }
 0x4f0   :  { %631 = vperm.xlu1 %1246, %v1252_v8  }
 0x56f   :  { %v632_v19 = vpop.permute.xlu1 %631 }
 0x570   :  { %v633_v22 = vrot.slane %v632_v19, 2 }
 0x572   :  { %v635_v29 = vmul.f32 %v633_v22, %v625_v13  ;;  %v636_v30 = vmul.f32 %v633_v22, %v626_v0 }
 0x574   :  { %v643_v33 = vmul.f32 %v639_v20, %v635_v29  ;;  %v644_v37 = vmul.f32 %v640_v21, %v636_v30 }
 0x576   :  { %v651_v38 = vadd.f32 %v647_v23, %v643_v33  ;;  %v652_v40 = vadd.f32 %v648_v26, %v644_v37 }
 0x578   :  { %v653_v41 = vadd.f32 %v651_v38, %v1508_v55  ;;  %v654_v43 = vadd.f32 %v652_v40, %v1510_v57 }
 0x57a   :  { %v1616_v45 = vmax.f32 %v653_v41, 0.0  ;;  %v1622_v46 = vmax.f32 %v654_v43, 0.0 }
 0x57c   :  { %698 = vrot.lane.b32.xlu0 %v1616_v45, %s1293_s5  ;;  %666 = vrot.lane.b32.xlu1 %v1616_v45, %s1285_s23 }
 0x580   :  { %708 = vrot.lane.b32.xlu0 %v1622_v46, %s1291_s4  ;;  %668 = vrot.lane.b32.xlu1 %v1622_v46, %s1285_s23 }
 0x584   :  { %716 = vrot.lane.b32.xlu0 %v1622_v46, %s1294_s6  ;;  %690 = vrot.lane.b32.xlu1 %v1616_v45, %s1290_s30 }
 0x588   :  { %692 = vrot.lane.b32.xlu1 %v1622_v46, %s1290_s30 }
 0x58c   :  { %674 = vrot.lane.b32.xlu1 %v1616_v45, %s1289_s0 }
 0x590   :  { %676 = vrot.lane.b32.xlu1 %v1622_v46, %s1289_s0 }
 0x594   :  { %700 = vrot.lane.b32.xlu1 %v1622_v46, %s1293_s5 }
 0x598   :  { %658 = vrot.lane.b32.xlu1 %v1616_v45, %s1288_s1 }
 0x59c   :  { %660 = vrot.lane.b32.xlu1 %v1622_v46, %s1288_s1 }
 0x5a0   :  { %682 = vrot.lane.b32.xlu1 %v1616_v45, %s1287_s2 }
 0x5a4   :  { %684 = vrot.lane.b32.xlu1 %v1622_v46, %s1287_s2 }
 0x5a8   :  { %706 = vrot.lane.b32.xlu1 %v1616_v45, %s1291_s4 }
 0x5ac   :  { %714 = vrot.lane.b32.xlu1 %v1616_v45, %s1294_s6 }
 0x5ee   :  { %v667_v55 = vpop.permute.xlu1 %666  ;;  %v699_v59 = vpop.permute.xlu0 %698 }
 0x5f2   :  { %v669_v57 = vpop.permute.xlu1 %668  ;;  %v709_v30 = vpop.permute.xlu0 %708 }
 0x5f3   :  { %v671_v58 = vsel %vm85_vm4, %v669_v57, %v667_v55  ;;  %v670_v60 = vsel %vm85_vm4, %v667_v55, %v669_v57 }
 0x5f4   :  { %v672_v0 = vmul.f32 %v671_v58, %v1411_v35  ;;  %v673_v5 = vmul.f32 %v670_v60, %v1414_v36 }
 0x5f6   :  { %v691_v47 = vpop.permute.xlu1 %690  ;;  %v724_v33 = vrot.slane %v672_v0, 6  ;;  %v725_v37 = vrot.slane %v673_v5, 6  ;;  %v717_v0 = vpop.permute.xlu0 %716 }
 0x5fa   :  { %v693_v49 = vpop.permute.xlu1 %692 }
 0x5fb   :  { %v694_v12 = vsel %vm151_vm6, %v691_v47, %v693_v49  ;;  %v695_v61 = vsel %vm151_vm6, %v693_v49, %v691_v47 }
 0x5fc   :  { %v696_v6 = vmul.f32 %v694_v12, %v1427_v44  ;;  %v697_v7 = vmul.f32 %v695_v61, %v1442_v56 }
 0x5fe   :  { %v675_v50 = vpop.permute.xlu1 %674  ;;  %v742_v38 = vrot.slane %v696_v6, 6  ;;  %v743_v41 = vrot.slane %v697_v7, 6 }
 0x600   :  { %v764_v60 = vsel %vm53_vm0, %v1616_v45, %v742_v38  ;;  %v765_v61 = vsel %vm53_vm0, %v1622_v46, %v743_v41 }
 0x602   :  { %v677_v51 = vpop.permute.xlu1 %676 }
 0x603   :  { %v679_v62 = vsel %vm107_vm3, %v677_v51, %v675_v50  ;;  %v678_v9 = vsel %vm107_vm3, %v675_v50, %v677_v51 }
 0x604   :  { %v680_v11 = vmul.f32 %v679_v62, %v1404_v32  ;;  %v681_v40 = vmul.f32 %v678_v9, %v1407_v34 }
 0x606   :  { %v701_v52 = vpop.permute.xlu1 %700  ;;  %v730_v43 = vrot.slane %v680_v11, 4  ;;  %v731_v12 = vrot.slane %v681_v40, 4 }
 0x607   :  { %v702_v63 = vsel %vm173_vm8, %v699_v59, %v701_v52  ;;  %v703_v13 = vsel %vm173_vm8, %v701_v52, %v699_v59 }
 0x608   :  { %v704_v14 = vmul.f32 %v702_v63, %v1471_v27  ;;  %v705_v15 = vmul.f32 %v703_v13, %v1474_v28 }
 0x60a   :  { %v659_v53 = vpop.permute.xlu1 %658  ;;  %v748_v55 = vrot.slane %v704_v14, 4  ;;  %v749_v57 = vrot.slane %v705_v15, 4 }
 0x60c   :  { %v767_v7 = vsel %vm259_vm5, %v765_v61, %v749_v57  ;;  %v873_v61 = vld [vmem:[#allocation2 + $0x20] sm:$0xc0] }
 0x60e   :  { %v661_v54 = vpop.permute.xlu1 %660 }
 0x60f   :  { %v663_v4 = vsel %vm63_vm2, %v661_v54, %v659_v53  ;;  %v662_v8 = vsel %vm63_vm2, %v659_v53, %v661_v54 }
 0x610   :  { %v664_v20 = vmul.f32 %v663_v4, %v1400_v31  ;;  %v665_v23 = vmul.f32 %v662_v8, %v1419_v39  ;;  %v766_v4 = vsel %vm259_vm5, %v764_v60, %v748_v55 }
 0x612   :  { %v683_v10 = vpop.permute.xlu1 %682  ;;  %v758_v49 = vsel %vm53_vm0, %v664_v20, %v724_v33  ;;  %v759_v53 = vsel %vm53_vm0, %v665_v23, %v725_v37  ;;  %v657_v20 = vld [vmem:[#allocation2] sm:$0x30] }
 0x613   :  { %v761_v6 = vsel %vm259_vm5, %v759_v53, %v731_v12  ;;  %v771_v23 = vrot.slane %v657_v20, 4 }
 0x616   :  { %v685_v19 = vpop.permute.xlu1 %684 }
 0x617   :  { %v686_v21 = vsel %vm129_vm1, %v683_v10, %v685_v19  ;;  %v687_v22 = vsel %vm129_vm1, %v685_v19, %v683_v10  ;;  %v760_v10 = vsel %vm259_vm5, %v758_v49, %v730_v43 }
 0x618   :  { %v688_v26 = vmul.f32 %v687_v22, %v1389_v24  ;;  %v689_v29 = vmul.f32 %v686_v21, %v1392_v25 }
 0x61a   :  { %v707_v47 = vpop.permute.xlu1 %706  ;;  %v736_v50 = vrot.slane %v688_v26, 2  ;;  %v737_v54 = vrot.slane %v689_v29, 2 }
 0x61b   :  { %v710_v51 = vsel %vm195_vm7, %v707_v47, %v709_v30  ;;  %v711_v52 = vsel %vm195_vm7, %v709_v30, %v707_v47 }
 0x61c   :  { %v712_v58 = vmul.f32 %v710_v51, %v1452_v1  ;;  %v713_v59 = vmul.f32 %v711_v52, %v1455_v2  ;;  %v762_v5 = vsel %vm508_vm11, %v760_v10, %v736_v50  ;;  %v763_v11 = vsel %vm508_vm11, %v761_v6, %v737_v54  ;;  %v874_v10 = vld [vmem:[#allocation2 + $0x28] sm:$0xc0] }
 0x61e   :  { %v754_v62 = vrot.slane %v712_v58, 2  ;;  %v755_v63 = vrot.slane %v713_v59, 2  ;;  %v715_v13 = vpop.permute.xlu1 %714 }
 0x61f   :  { %v719_v9 = vsel %vm217_vm9, %v717_v0, %v715_v13  ;;  %v718_v21 = vsel %vm217_vm9, %v715_v13, %v717_v0  ;;  %v891_v0 = vrot.slane %v873_v61, 6 }
 0x620   :  { %v768_v8 = vsel %vm508_vm11, %v766_v4, %v754_v62  ;;  %v769_v14 = vsel %vm508_vm11, %v767_v7, %v755_v63  ;;  %v721_v22 = vmul.f32 %v719_v9, %v1482_v42  ;;  %v720_v26 = vmul.f32 %v718_v21, %v1487_v48  ;;  %v875_v62 = vld [vmem:[#allocation2 + $0x30] sm:$0x60]  ;;  %v876_v63 = vld [vmem:[#allocation2 + $0x38] sm:$0x60] }
 0x621   :  { %v1224_v15 = vpack.c.bf16 %v769_v14, %v763_v11  ;;  %v1226_v19 = vpack.c.bf16 %v768_v8, %v762_v5  ;;  %v892_v4 = vrot.slane %v874_v10, 6  ;;  %v899_v6 = vrot.slane %v875_v62, 5 }
 0x622   :  { %v900_v7 = vrot.slane %v876_v63, 5 }
 0x623   :  { %1225 = vmatprep.subr.bf16.mxu1 %v1224_v15 }
 0x624   :  { %1227 = vmatpush1.bf16.msra.mxu1 %v1226_v19 }
 0x625   :  { %1206 = vmatprep.subr.msk.mxu1 %vm53_vm0, %v721_v22 }
 0x628   :  { %1207 = vmatpush1.msk.msra.mxu1 %vm53_vm0, %v720_v26 }
 0x629   :  { %1208 = vmatmul.mubr.msk.f32.vlgmr.msra.gmra.mrb[2].mxu1 %vm519_vm12, %v771_v23 }
 0x6fc   :  { %v846_v29 = vpop.f32.mrb[2].mxu1 }
 0x6fd   :  { %v851_v30 = vmul.f32 %v846_v29, %v846_v29  ;;  %v848_v33 = vpop.f32.mrb[3].mxu1 }
 0x6fe   :  { %v852_v37 = vmul.f32 %v848_v33, %v848_v33 }
 0x6ff   :  { %v855_v38 = vrot.slane %v851_v30, 6 }
 0x700   :  { %v856_v40 = vrot.slane %v852_v37, 6 }
 0x701   :  { %v859_v41 = vsel %vm53_vm0, %v846_v29, %v855_v38 }
 0x702   :  { %v860_v43 = vsel %vm53_vm0, %v848_v33, %v856_v40  ;;  %v861_v55 = vsel %vm259_vm5, %v859_v41, 0.0 }
 0x703   :  { %v862_v57 = vsel %vm259_vm5, %v860_v43, 0.0 }
 0x704   :  { %v863_v47 = vadd.f32 %v862_v57, %v861_v55 }
 0x706   :  { %864 = vadd.xlane.f32.xlu1 %v863_v47 }
 0x793   :  { %v865_v49 = vpop.xlane.xlu1 %864 }
 0x794   :  { %v866_v50 = vmul.f32 0.00390625, %v865_v49 }
 0x796   :  { %v867_v51 = vmul.f32 %v866_v50, %v866_v50  ;;  %v877_v52 = vsub.f32 %v846_v29, %v866_v50  ;;  %v878_v53 = vsub.f32 %v848_v33, %v866_v50 }
 0x798   :  { %v869_v54 = vrot.slane %v867_v51, 6 }
 0x79a   :  { %v871_v58 = vsub.f32 %v866_v50, %v869_v54 }
 0x79c   :  { %v872_v59 = vmax.f32 %v871_v58, 0.0 }
 0x79e   :  { %v879_v60 = vadd.f32 1e-05, %v872_v59 }
 0x7a0   :  { %1253 = vrsqrt.f32 %v879_v60 }
 0x7aa   :  { %v1254_v12 = vpop.eup %1253 }
 0x7ab   :  { %883 = vperm.xlu0 %1247, %v1254_v12  }
 0x82a   :  { %v884_v13 = vpop.permute.xlu0 %883 }
 0x82b   :  { %v885_v5 = vrot.slane %v884_v13, 2 }
 0x82d   :  { %v887_v8 = vmul.f32 %v885_v5, %v877_v52  ;;  %v888_v9 = vmul.f32 %v885_v5, %v878_v53 }
 0x82f   :  { %v895_v11 = vmul.f32 %v891_v0, %v887_v8  ;;  %v896_v14 = vmul.f32 %v892_v4, %v888_v9 }
 0x831   :  { %v903_v15 = vadd.f32 %v899_v6, %v895_v11  ;;  %v904_v19 = vadd.f32 %v900_v7, %v896_v14 }
 0x833   :  { %v905_v20 = vadd.f32 %v903_v15, %v1616_v45  ;;  %v906_v21 = vadd.f32 %v904_v19, %v1622_v46 }
 0x835   :  { %v1723_v22 = vmax.f32 %v905_v20, 0.0  ;;  %v1725_v23 = vmax.f32 %v906_v21, 0.0 }
 0x837   :  { %952 = vrot.lane.b32.xlu1 %v1725_v23, %s1293_s5  ;;  %918 = vrot.lane.b32.xlu0 %v1723_v22, %s1285_s23 }
 0x83b   :  { %958 = vrot.lane.b32.xlu1 %v1723_v22, %s1291_s4  ;;  %920 = vrot.lane.b32.xlu0 %v1725_v23, %s1285_s23 }
 0x83f   :  { %966 = vrot.lane.b32.xlu1 %v1723_v22, %s1294_s6  ;;  %942 = vrot.lane.b32.xlu0 %v1723_v22, %s1290_s30 }
 0x843   :  { %944 = vrot.lane.b32.xlu0 %v1725_v23, %s1290_s30 }
 0x847   :  { %926 = vrot.lane.b32.xlu0 %v1723_v22, %s1289_s0 }
 0x84b   :  { %928 = vrot.lane.b32.xlu0 %v1725_v23, %s1289_s0 }
 0x84f   :  { %950 = vrot.lane.b32.xlu0 %v1723_v22, %s1293_s5 }
 0x853   :  { %910 = vrot.lane.b32.xlu0 %v1723_v22, %s1288_s1 }
 0x857   :  { %912 = vrot.lane.b32.xlu0 %v1725_v23, %s1288_s1 }
 0x85b   :  { %934 = vrot.lane.b32.xlu0 %v1723_v22, %s1287_s2 }
 0x85f   :  { %936 = vrot.lane.b32.xlu0 %v1725_v23, %s1287_s2 }
 0x863   :  { %960 = vrot.lane.b32.xlu0 %v1725_v23, %s1291_s4 }
 0x867   :  { %968 = vrot.lane.b32.xlu0 %v1725_v23, %s1294_s6 }
 0x8a9   :  { %v919_v45 = vpop.permute.xlu0 %918  ;;  %v953_v43 = vpop.permute.xlu1 %952 }
 0x8ad   :  { %v921_v46 = vpop.permute.xlu0 %920 }
 0x8ae   :  { %v923_v41 = vsel %vm85_vm4, %v921_v46, %v919_v45  ;;  %v922_v55 = vsel %vm85_vm4, %v919_v45, %v921_v46 }
 0x8af   :  { %v924_v53 = vmul.f32 %v923_v41, %v1411_v35  ;;  %v925_v58 = vmul.f32 %v922_v55, %v1414_v36 }
 0x8b1   :  { %v943_v26 = vpop.permute.xlu0 %942  ;;  %v976_v5 = vrot.slane %v924_v53, 6  ;;  %v909_v53 = vld [vmem:[#allocation2 + $0x6] ss:$0 sm:$0xff] }
 0x8b5   :  { %v945_v29 = vpop.permute.xlu0 %944 }
 0x8b6   :  { %v946_v57 = vsel %vm151_vm6, %v943_v26, %v945_v29  ;;  %v947_v47 = vsel %vm151_vm6, %v945_v29, %v943_v26 }
 0x8b7   :  { %v948_v59 = vmul.f32 %v946_v57, %v1427_v44  ;;  %v949_v60 = vmul.f32 %v947_v47, %v1442_v56 }
 0x8b9   :  { %v927_v30 = vpop.permute.xlu0 %926  ;;  %v994_v6 = vrot.slane %v948_v59, 6  ;;  %v995_v7 = vrot.slane %v949_v60, 6 }
 0x8bb   :  { %v1016_v21 = vsel %vm53_vm0, %v1723_v22, %v994_v6  ;;  %v1017_v46 = vsel %vm53_vm0, %v1725_v23, %v995_v7 }
 0x8bd   :  { %v929_v33 = vpop.permute.xlu0 %928 }
 0x8be   :  { %v931_v50 = vsel %vm107_vm3, %v929_v33, %v927_v30  ;;  %v930_v61 = vsel %vm107_vm3, %v927_v30, %v929_v33 }
 0x8bf   :  { %v932_v10 = vmul.f32 %v931_v50, %v1404_v32  ;;  %v959_v32 = vpop.permute.xlu1 %958 }
 0x8c1   :  { %v951_v37 = vpop.permute.xlu0 %950 }
 0x8c2   :  { %v954_v51 = vsel %vm173_vm8, %v951_v37, %v953_v43  ;;  %v955_v52 = vsel %vm173_vm8, %v953_v43, %v951_v37 }
 0x8c3   :  { %v956_v62 = vmul.f32 %v954_v51, %v1471_v27  ;;  %v957_v35 = vmul.f32 %v955_v52, %v1474_v28  ;;  %v977_v27 = vrot.slane %v925_v58, 6  ;;  %v933_v28 = vmul.f32 %v930_v61, %v1407_v34  ;;  %v967_v37 = vpop.permute.xlu1 %966 }
 0x8c5   :  { %v911_v38 = vpop.permute.xlu0 %910  ;;  %v1000_v8 = vrot.slane %v956_v62, 4  ;;  %v1001_v9 = vrot.slane %v957_v35, 4  ;;  %v983_v45 = vrot.slane %v933_v28, 4  ;;  %v1103_v35 = vld [vmem:[#allocation2 + $0x21] ss:$8 sm:$0x3] }
 0x8c9   :  { %v913_v40 = vpop.permute.xlu0 %912 }
 0x8ca   :  { %v915_v54 = vsel %vm63_vm2, %v913_v40, %v911_v38  ;;  %v914_v12 = vsel %vm63_vm2, %v911_v38, %v913_v40  ;;  %v1018_v38 = vsel %vm259_vm5, %v1016_v21, %v1000_v8 }
 0x8cb   :  { %v916_v13 = vmul.f32 %v915_v54, %v1400_v31  ;;  %v917_v56 = vmul.f32 %v914_v12, %v1419_v39  ;;  %v982_v31 = vrot.slane %v932_v10, 4  ;;  %v1296_v54 = vmov 1966171168  }
 0x8cc   :  { %v1110_v58 = vunpack.c.l.s4 %v1296_v54 }
 0x8cd   :  { %v935_v49 = vpop.permute.xlu0 %934  ;;  %v1010_v14 = vsel %vm53_vm0, %v916_v13, %v976_v5 }
 0x8ce   :  { %v1012_v26 = vsel %vm259_vm5, %v1010_v14, %v982_v31  ;;  %v1111_v59 = vunpack.c.0.s8 %v1110_v58 }
 0x8d0   :  { %v1114_v16 = vsub.s32 %v1111_v59, %v1330_v3 }
 0x8d1   :  { %v937_v63 = vpop.permute.xlu0 %936 }
 0x8d2   :  { %v938_v36 = vsel %vm129_vm1, %v935_v49, %v937_v63  ;;  %v939_v44 = vsel %vm129_vm1, %v937_v63, %v935_v49 }
 0x8d3   :  { %v940_v0 = vmul.f32 %v939_v44, %v1389_v24  ;;  %v941_v4 = vmul.f32 %v938_v36, %v1392_v25  ;;  %v1011_v25 = vsel %vm53_vm0, %v917_v56, %v977_v27 }
 0x8d5   :  { %v961_v11 = vpop.permute.xlu0 %960  ;;  %v988_v15 = vrot.slane %v940_v0, 2  ;;  %v989_v19 = vrot.slane %v941_v4, 2 }
 0x8d6   :  { %v962_v39 = vsel %vm195_vm7, %v959_v32, %v961_v11  ;;  %v963_v24 = vsel %vm195_vm7, %v961_v11, %v959_v32 }
 0x8d7   :  { %v964_v20 = vmul.f32 %v962_v39, %v1452_v1  ;;  %v965_v34 = vmul.f32 %v963_v24, %v1455_v2  ;;  %v1014_v40 = vsel %vm508_vm11, %v1012_v26, %v988_v15  ;;  %v1013_v1 = vsel %vm259_vm5, %v1011_v25, %v983_v45  ;;  %v1161_v24 = vld [vmem:[#allocation2 + $0x37] ss:$0 sm:$0xff]  ;;  %v1162_v25 = vld [vmem:[#allocation2 + $0x41] ss:$0 sm:$0xff]  ;;  %v1163_v26 = vld [vmem:[#allocation2 + $0x40] ss:$0 sm:$0xff] }
 0x8d8   :  { %v1019_v2 = vsel %vm259_vm5, %v1017_v46, %v1001_v9  ;;  %v1015_v55 = vsel %vm508_vm11, %v1013_v1, %v989_v19 }
 0x8d9   :  { %v1006_v29 = vrot.slane %v964_v20, 2  ;;  %v1007_v30 = vrot.slane %v965_v34, 2  ;;  %v969_v33 = vpop.permute.xlu0 %968  ;;  %v1177_v34 = vmul.f32 %v1162_v25, %v1161_v24 }
 0x8da   :  { %v971_v43 = vsel %vm217_vm9, %v969_v33, %v967_v37  ;;  %v970_v50 = vsel %vm217_vm9, %v967_v37, %v969_v33 }
 0x8db   :  { %v1020_v41 = vsel %vm508_vm11, %v1018_v38, %v1006_v29  ;;  %v1021_v57 = vsel %vm508_vm11, %v1019_v2, %v1007_v30  ;;  %v973_v51 = vmul.f32 %v971_v43, %v1482_v42  ;;  %v972_v52 = vmul.f32 %v970_v50, %v1487_v48 }
 0x8dc   :  { %v1228_v47 = vpack.c.bf16 %v1021_v57, %v1015_v55  ;;  %v1230_v49 = vpack.c.bf16 %v1020_v41, %v1014_v40 }
 0x8de   :  { %1229 = vmatprep.subr.bf16.mxu0 %v1228_v47 }
 0x8df   :  { %1231 = vmatpush1.bf16.msra.mxu0 %v1230_v49 }
 0x8e0   :  { %1209 = vmatprep.subr.msk.mxu0 %vm53_vm0, %v973_v51 }
 0x8e3   :  { %1210 = vmatpush1.msk.msra.mxu0 %vm53_vm0, %v972_v52 }
 0x8e4   :  { %1211 = vmatmul.mubr.msk.f32.vlgmr.msra.gmra.mrb[2].mxu0 %vm519_vm12, %v909_v53 }
 0x9b7   :  { %v1097_v60 = vpop.f32.mrb[2].mxu0 }
 0x9b8   :  { %v1099_v12 = vpop.f32.mrb[3].mxu0  ;;  %v1104_v42 = vmul.f32 %v1097_v60, %v1097_v60 }
 0x9b9   :  { %v1108_v61 = vcombine.low %v1097_v60, %v1099_v12  ;;  %v1105_v10 = vmul.f32 %v1099_v12, %v1099_v12 }
 0x9ba   :  { %v1127_v13 = vrot.slane %v1104_v42, 7 }
 0x9bb   :  { %v1115_v62 = vrot.slane %v1108_v61, %v1114_v16  ;;  %v1128_v48 = vrot.slane %v1105_v10, 7 }
 0x9bc   :  { %v1143_v0 = vsel %vm1142_vm13, %v1097_v60, %v1127_v13 }
 0x9bd   :  { %v1122_v63 = vrot.slane %v1115_v62, %v1114_v16  ;;  %v1144_v4 = vsel %vm1142_vm13, %v1099_v12, %v1128_v48 }
 0x9bf   :  { %v1124_v36 = vmul.f32 %v1122_v63, %v1103_v35 }
 0x9c1   :  { %v1135_v44 = vrot.slane %v1124_v36, %v1382_v17  ;;  %v1139_v56 = vrot.slane %v1124_v36, %v1385_v18  ;;  %v1160_v18 = vld [vmem:[#allocation2 + $0x30] ss:$0 sm:$0xff] }
 0x9c3   :  { %v1145_v3 = vsel %vm53_vm0, %v1143_v0, %v1135_v44  ;;  %v1146_v32 = vsel %vm53_vm0, %v1144_v4, %v1139_v56 }
 0x9c4   :  { %v1148_v5 = vsel %vm1147_vm14, %v1145_v3, 0.0  ;;  %v1149_v27 = vsel %vm1147_vm14, %v1146_v32, 0.0 }
 0x9c5   :  { %v1150_v6 = vadd.f32 %v1149_v27, %v1148_v5 }
 0x9c7   :  { %1151 = vadd.xlane.f32.xlu1 %v1150_v6 }
 0xa54   :  { %v1152_v28 = vpop.xlane.xlu1 %1151 }
 0xa55   :  { %v1153_v7 = vmul.f32 0.00390625, %v1152_v28  ;;  %v1168_v19 = vrot.slane %v1152_v28, 1 }
 0xa57   :  { %v1154_v31 = vmul.f32 %v1153_v7, %v1153_v7  ;;  %v1172_v39 = vrot.slane %v1153_v7, 7 }
 0xa59   :  { %v1156_v8 = vrot.slane %v1154_v31, 7 }
 0xa5b   :  { %v1158_v9 = vsub.f32 %v1153_v7, %v1156_v8 }
 0xa5d   :  { %v1159_v11 = vmax.f32 %v1158_v9, 0.0 }
 0xa5f   :  { %v1164_v17 = vadd.f32 1e-05, %v1159_v11 }
 0xa61   :  { %1255 = vrsqrt.f32 %v1164_v17 }
 0xa6b   :  { %v1256_v14 = vpop.eup %1255 }
 0xa6c   :  { %v1166_v15 = vmul.f32 %v1256_v14, %v1160_v18 }
 0xa6e   :  { %v1174_v20 = vmul.f32 %v1172_v39, %v1166_v15  ;;  %v1170_v21 = vmul.f32 %v1168_v19, %v1166_v15 }
 0xa70   :  { %v1175_v45 = vmul.f32 %v1174_v20, %v1162_v25 }
 0xa72   :  { %v1176_v46 = vsub.f32 %v1170_v21, %v1175_v45 }
 0xa74   :  { %v1178_v29 = vadd.f32 %v1177_v34, %v1176_v46 }
 0xa76   :  { %v1179_v30 = vadd.f32 %v1178_v29, %v1163_v26 }
 0xa78   :  { %1257 = vtanh.f32 %v1179_v30 }
 0xa82   :  { %v1258_v33 = vpop.eup %1257 }
 0xa83   :  { %1183 = vperm.xlu0 %1247, %v1258_v33  }
 0xb02   :  { %v1184_v37 = vpop.permute.xlu0 %1183 }
 0xb03   :  { %v1185_v38 = vrot.slane %v1184_v37, 7 }
 0xb05   :  { %v1187_v40 = vsel %vm53_vm0, %v1723_v22, %v1185_v38  ;;  %v1188_v1 = vsel %vm53_vm0, %v1725_v23, %v1185_v38 }
 0xb06   :  { %v1191_v2 = vcombine.low %v1187_v40, %v1188_v1 }
 0xb08   :  { %1193 = vst [vmem:[%s1839_s3] sm:$0x77] %v1191_v2 }
 0xb09   :  { %1198 = vsyncpa [#allocation3], 1 }

</bundles_post_ra>
